<compile_context>
chip_gen: v7x
topology: tpu7x:2x2x1
jax: 0.10.0
libtpu: 0.0.40
codegen_flags: <defaults>
</compile_context>

<pallas_src>
import functools

import jax
import jax.numpy as jnp
import numpy as np
from jax import lax
from jax.experimental import pallas as pl
from jax.experimental.pallas import tpu as pltpu

T = 4                     # branch multiplier `t` from the PyTorch module
KB = 39                   # fused branch kernel taps (largest conv kernel)
MAXPAD = (KB - 1) // 2    # 19


# --------------------------------------------------------------------------
# Kernel 1: bottleneck + fused branch/skip convs -> pre-BN activations + stats
# --------------------------------------------------------------------------
def conv_pre_kernel(x_ref, w_s_ref, b_s_ref, w_br_ref, w_xp_ref,
                    pre_ref, stats_ref, bpad_scr, ppad_scr):
    n = pl.program_id(0)
    L = pre_ref.shape[1]
    B = w_s_ref.shape[1]
    IC = x_ref.shape[2]

    # one-time init: halo rows of the padded scratches + the BN stats accumulator
    @pl.when(n == 0)
    def _():
        bpad_scr[0:MAXPAD, :] = jnp.zeros((MAXPAD, B), jnp.float32)
        bpad_scr[MAXPAD + L:MAXPAD + L + MAXPAD, :] = jnp.zeros((MAXPAD, B), jnp.float32)
        ppad_scr[0:1, :] = jnp.zeros((1, IC), jnp.float32)
        ppad_scr[L + 1:L + 2, :] = jnp.zeros((1, IC), jnp.float32)
        stats_ref[...] = jnp.zeros_like(stats_ref)

    x1 = x_ref[0].astype(jnp.float32)            # (L+2, IC); rows 0 and L+1 are zero pad
    x_core = x1[1:L + 1, :]                      # (L, IC)

    # ---- 1x1 bottleneck conv + bias (bf16 MXU, f32 accumulation) ----
    b = jnp.dot(x_core.astype(jnp.bfloat16), w_s_ref[...],
                preferred_element_type=jnp.float32) + b_s_ref[...]        # (L, B) f32

    # ---- im2col of the zero-padded bottleneck for the fused 39-tap branch conv ----
    bpad_scr[MAXPAD:MAXPAD + L, :] = b
    b_pad = bpad_scr[...]                                                  # (L+38, B)
    bcol = jnp.concatenate([b_pad[k:k + L, :] for k in range(KB)], axis=-1)  # (L, 39*B)

    # ---- maxpool(3, stride 1, pad 1, -inf padding) on x ----
    row = lax.broadcasted_iota(jnp.int32, (L + 2, IC), 0)
    xm = jnp.where((row >= 1) & (row <= L), x1, -jnp.inf)
    pooled = jnp.maximum(jnp.maximum(xm[0:L, :], xm[1:L + 1, :]), xm[2:L + 2, :])
    ppad_scr[1:L + 1, :] = pooled                 # zero pad 1 for the 3-tap conv
    p_pad = ppad_scr[...]                         # (L+2, IC)

    # ---- shared im2col for the fused (t_conv on pooled | skip conv on x) matmul ----
    xpcol = jnp.concatenate([p_pad[k:k + L, :] for k in range(3)]
                            + [x1[k:k + L, :] for k in range(3)], axis=-1)   # (L, 6*IC)

    # ---- two lane-dense MXU matmuls produce the concatenated branches + skip ----
    pre = jnp.dot(bcol.astype(jnp.bfloat16), w_br_ref[...],
                  preferred_element_type=jnp.float32)
    pre = pre + jnp.dot(xpcol.astype(jnp.bfloat16), w_xp_ref[...],
                        preferred_element_type=jnp.float32)                  # (L, Cpad)

    pre_ref[0] = pre

    # ---- accumulate per-channel sum / sum-of-squares for BatchNorm pass 2 ----
    stats_ref[0:1, :] += jnp.sum(pre, axis=0, keepdims=True)
    stats_ref[1:2, :] += jnp.sum(pre * pre, axis=0, keepdims=True)


# --------------------------------------------------------------------------
# Kernel 2: BatchNorm (batch statistics) + ReLU
# --------------------------------------------------------------------------
def bn_relu_kernel(pre_ref, stats_ref, gamma_ref, beta_ref, out_ref, *, count, eps):
    pre = pre_ref[0]                                          # (L, Cpad) f32
    inv_n = 1.0 / count
    mean = stats_ref[0:1, :] * inv_n                          # (1, Cpad)
    var = jnp.maximum(stats_ref[1:2, :] * inv_n - mean * mean, 0.0)
    scale = gamma_ref[...] * lax.rsqrt(var + eps)
    shift = beta_ref[...] - mean * scale
    out_ref[0] = jnp.maximum(pre * scale + shift, 0.0)


# --------------------------------------------------------------------------
# Parameters (matching the PyTorch module's shapes / init semantics)
# --------------------------------------------------------------------------
def init_params(key, ic, oc_filter, bottle_neck=32):
    ks = jax.random.split(key, 8)
    mk = lambda k, shape: (0.1 * jax.random.normal(k, shape)).astype(jnp.float32)
    return {
        "w_s":    mk(ks[0], (ic, bottle_neck)),               # 1x1 conv weight
        "b_s":    mk(ks[1], (1, bottle_neck)),                # 1x1 conv bias
        "w_b":    mk(ks[2], (39, bottle_neck, oc_filter)),
        "w_m":    mk(ks[3], (19, bottle_neck, oc_filter)),
        "w_s9":   mk(ks[4], (9, bottle_neck, oc_filter)),
        "w_t":    mk(ks[5], (3, ic, oc_filter)),
        "w_skip": mk(ks[6], (3, ic, T * oc_filter)),
        "gamma":  jnp.ones((1, T * oc_filter), jnp.float32),  # BN init
        "beta":   jnp.zeros((1, T * oc_filter), jnp.float32),
    }


# --------------------------------------------------------------------------
# Wrapper: host-side weight fusion + two pallas_calls
# --------------------------------------------------------------------------
def conv_block_forward(x, params):
    """x: (N, ic, L) float32 (PyTorch NCL).  Returns (N, 4*oc_filter, L)."""
    N, IC, L = x.shape
    OC = params["w_b"].shape[2]
    B = params["w_s"].shape[1]
    C = T * OC
    Cpad = ((C + 127) // 128) * 128          # lane-dense output channels

    # channels-last activations, bf16 on the wire, zero halo of 1 for the 3-tap convs
    xt = jnp.transpose(x, (0, 2, 1)).astype(jnp.bfloat16)      # (N, L, IC)
    x_pad1 = jnp.pad(xt, ((0, 0), (1, 1), (0, 0)))             # (N, L+2, IC)

    # fused 39-tap branch weight -> channels [y_b | y_m | y_s | (y_t slot) | pad]
    w_all = jnp.zeros((KB, B, Cpad), jnp.float32)
    w_all = w_all.at[:, :, 0:OC].set(params["w_b"])
    w_all = w_all.at[10:29, :, OC:2 * OC].set(params["w_m"])        # K=19 centered in K=39
    w_all = w_all.at[15:24, :, 2 * OC:3 * OC].set(params["w_s9"])   # K=9  centered in K=39
    w_branch = w_all.reshape(KB * B, Cpad).astype(jnp.bfloat16)

    # fused (t_conv | skip) weight: rows 0..3*IC act on pooled-x taps, rows 3*IC.. on x taps
    w_xp = jnp.zeros((6 * IC, Cpad), jnp.float32)
    w_xp = w_xp.at[0:3 * IC, 3 * OC:4 * OC].set(params["w_t"].reshape(3 * IC, OC))
    w_xp = w_xp.at[3 * IC:6 * IC, 0:4 * OC].set(params["w_skip"].reshape(3 * IC, 4 * OC))
    w_xp = w_xp.astype(jnp.bfloat16)

    w_s = params["w_s"].astype(jnp.bfloat16)
    b_s = params["b_s"].astype(jnp.float32)
    gamma_pad = jnp.zeros((1, Cpad), jnp.float32).at[:, :C].set(params["gamma"])
    beta_pad = jnp.zeros((1, Cpad), jnp.float32).at[:, :C].set(params["beta"])

    flops = 2 * N * L * (IC * B + KB * B * Cpad + 6 * IC * Cpad)
    bytes_accessed = (x_pad1.size * 2 + w_branch.size * 2 + w_xp.size * 2
                      + w_s.size * 2 + b_s.size * 4
                      + N * L * Cpad * 4 + 2 * Cpad * 4)

    pre, stats = pl.pallas_call(
        conv_pre_kernel,
        out_shape=(jax.ShapeDtypeStruct((N, L, Cpad), jnp.float32),
                   jax.ShapeDtypeStruct((2, Cpad), jnp.float32)),
        grid_spec=pltpu.PrefetchScalarGridSpec(
            num_scalar_prefetch=0,
            grid=(N,),
            in_specs=[
                pl.BlockSpec((1, L + 2, IC), lambda n: (n, 0, 0)),
                pl.BlockSpec((IC, B), lambda n: (0, 0)),
                pl.BlockSpec((1, B), lambda n: (0, 0)),
                pl.BlockSpec((KB * B, Cpad), lambda n: (0, 0)),
                pl.BlockSpec((6 * IC, Cpad), lambda n: (0, 0)),
            ],
            out_specs=[
                pl.BlockSpec((1, L, Cpad), lambda n: (n, 0, 0)),
                pl.BlockSpec((2, Cpad), lambda n: (0, 0)),
            ],
            scratch_shapes=[
                pltpu.VMEM((L + 2 * MAXPAD, B), jnp.float32),   # zero-padded bottleneck
                pltpu.VMEM((L + 2, IC), jnp.float32),           # zero-padded pooled x
            ]),
        compiler_params=pltpu.CompilerParams(
            dimension_semantics=("arbitrary",)),                # stats accumulate across grid
        cost_estimate=pl.CostEstimate(flops=flops, transcendentals=0,
                                      bytes_accessed=bytes_accessed),
    )(x_pad1, w_s, b_s, w_branch, w_xp)

    out = pl.pallas_call(
        functools.partial(bn_relu_kernel, count=float(N * L), eps=1e-5),
        out_shape=jax.ShapeDtypeStruct((N, L, Cpad), jnp.float32),
        grid_spec=pltpu.PrefetchScalarGridSpec(
            num_scalar_prefetch=0,
            grid=(N,),
            in_specs=[
                pl.BlockSpec((1, L, Cpad), lambda n: (n, 0, 0)),
                pl.BlockSpec((2, Cpad), lambda n: (0, 0)),
                pl.BlockSpec((1, Cpad), lambda n: (0, 0)),
                pl.BlockSpec((1, Cpad), lambda n: (0, 0)),
            ],
            out_specs=pl.BlockSpec((1, L, Cpad), lambda n: (n, 0, 0))),
        compiler_params=pltpu.CompilerParams(
            dimension_semantics=("parallel",)),
    )(pre, stats, gamma_pad, beta_pad)

    return jnp.transpose(out[:, :, :C], (0, 2, 1))              # back to NCL


# --------------------------------------------------------------------------
# Pure-JAX reference.  All dots/convs are f32 x f32 -> f32 (portable: no
# bf16 x bf16 dot, which some non-MXU backends reject), but matmul INPUTS are
# first rounded through bf16 to mirror the kernel's MXU precision (exact bf16
# products, f32 accumulation).  Element-wise / BN math stays f32.
# --------------------------------------------------------------------------
def conv_block_reference(x, params):
    def r(v):  # round to bf16, compute in f32
        return v.astype(jnp.bfloat16).astype(jnp.float32)

    def conv1d_ncl(x_ncl, w_kio, pad):
        w_oik = jnp.transpose(w_kio, (2, 1, 0))
        return lax.conv_general_dilated(
            r(x_ncl), r(w_oik), window_strides=(1,),
            padding=[(pad, pad)], dimension_numbers=("NCH", "OIH", "NCH"),
            preferred_element_type=jnp.float32)

    b = jnp.einsum("ncl,cb->nbl", r(x), r(params["w_s"]),
                   preferred_element_type=jnp.float32)
    b = b + params["b_s"][0][None, :, None]

    y_b = conv1d_ncl(b, params["w_b"], 19)
    y_m = conv1d_ncl(b, params["w_m"], 9)
    y_s = conv1d_ncl(b, params["w_s9"], 4)

    L = x.shape[2]
    xpad = jnp.pad(x, ((0, 0), (0, 0), (1, 1)), constant_values=-jnp.inf)
    pooled = jnp.maximum(jnp.maximum(xpad[:, :, 0:L], xpad[:, :, 1:L + 1]),
                         xpad[:, :, 2:L + 2])
    y_t = conv1d_ncl(pooled, params["w_t"], 1)
    y_skip = conv1d_ncl(x, params["w_skip"], 1)

    pre = jnp.concatenate([y_b, y_m, y_s, y_t], axis=1) + y_skip
    mu = jnp.mean(pre, axis=(0, 2), keepdims=True)
    var = jnp.mean((pre - mu) ** 2, axis=(0, 2), keepdims=True)
    y = (pre - mu) / jnp.sqrt(var + 1e-5)
    y = y * params["gamma"][0][None, :, None] + params["beta"][0][None, :, None]
    return jnp.maximum(y, 0.0)


if __name__ == "__main__":
    # small shapes consistent with the module: Conv1d input (N, ic, L)
    N, IC, L = 2, 4, 64
    OC_FILTER, BOTTLE_NECK = 8, 32

    key = jax.random.PRNGKey(0)
    kx, kp = jax.random.split(key)
    x = jax.random.normal(kx, (N, IC, L), dtype=jnp.float32)
    params = init_params(kp, IC, OC_FILTER, BOTTLE_NECK)

    out = jax.block_until_ready(conv_block_forward(x, params))
    ref = jax.block_until_ready(conv_block_reference(x, params))

    assert out.shape == (N, T * OC_FILTER, L), out.shape
    np.testing.assert_allclose(np.asarray(out), np.asarray(ref),
                               rtol=2e-3, atol=2e-3)
    print("KERNEL_OK")
</pallas_src>

<mosaic_0001>
module attributes {stable_mosaic.version = 11 : i64} {
  func.func @conv_pre_kernel(%arg0: i32, %arg1: memref<1x66x4xbf16, #tpu.memory_space<vmem>>, %arg2: memref<4x32xbf16, #tpu.memory_space<vmem>>, %arg3: memref<1x32xf32, #tpu.memory_space<vmem>>, %arg4: memref<1248x128xbf16, #tpu.memory_space<vmem>>, %arg5: memref<24x128xbf16, #tpu.memory_space<vmem>>, %arg6: memref<1x64x128xf32, #tpu.memory_space<vmem>>, %arg7: memref<2x128xf32, #tpu.memory_space<vmem>>, %arg8: memref<102x32xf32, #tpu.memory_space<vmem>>, %arg9: memref<66x4xf32, #tpu.memory_space<vmem>>) attributes {dimension_semantics = [#tpu.dimension_semantics<arbitrary>], iteration_bounds = array<i64: 2>, scalar_prefetch = 0 : i64, scratch_operands = 2 : i64, tpu.core_type = #tpu.core_type<tc>, window_params = [{transform_indices = @transform_0, window_bounds = array<i64: 1, 66, 4>}, {pipeline_mode = #tpu.pipeline_mode<synchronous>, transform_indices = @transform_1, window_bounds = array<i64: 4, 32>}, {pipeline_mode = #tpu.pipeline_mode<synchronous>, transform_indices = @transform_2, window_bounds = array<i64: 1, 32>}, {pipeline_mode = #tpu.pipeline_mode<synchronous>, transform_indices = @transform_3, window_bounds = array<i64: 1248, 128>}, {pipeline_mode = #tpu.pipeline_mode<synchronous>, transform_indices = @transform_4, window_bounds = array<i64: 24, 128>}, {transform_indices = @transform_5, window_bounds = array<i64: 1, 64, 128>}, {pipeline_mode = #tpu.pipeline_mode<synchronous>, transform_indices = @transform_6, window_bounds = array<i64: 2, 128>}]} {
    %c0_i32 = arith.constant 0 : i32
    %0 = arith.cmpi eq, %arg0, %c0_i32 : i32
    %1 = arith.extui %0 : i1 to i32
    %c0_i32_0 = arith.constant 0 : i32
    %2 = arith.cmpi ne, %1, %c0_i32_0 : i32
    scf.if %2 {
      %cst_33 = arith.constant 0.000000e+00 : f32
      %101 = vector.broadcast %cst_33 : f32 to vector<19x32xf32>
      %c0_34 = arith.constant 0 : index
      %c0_35 = arith.constant 0 : index
      %102 = vector.load %arg8[%c0_34, %c0_35] : memref<102x32xf32, #tpu.memory_space<vmem>>, vector<19x32xf32>
      tpu.vector_store %arg8[%c0_34, %c0_35], %101 {strides = array<i32>} : memref<102x32xf32, #tpu.memory_space<vmem>>, vector<19x32xf32>,
      %cst_36 = arith.constant 0.000000e+00 : f32
      %103 = vector.broadcast %cst_36 : f32 to vector<19x32xf32>
      %c83 = arith.constant 83 : index
      %c0_37 = arith.constant 0 : index
      %104 = vector.load %arg8[%c83, %c0_37] : memref<102x32xf32, #tpu.memory_space<vmem>>, vector<19x32xf32>
      tpu.vector_store %arg8[%c83, %c0_37], %103 {strides = array<i32>} : memref<102x32xf32, #tpu.memory_space<vmem>>, vector<19x32xf32>,
      %cst_38 = arith.constant 0.000000e+00 : f32
      %105 = vector.broadcast %cst_38 : f32 to vector<1x4xf32>
      %c0_39 = arith.constant 0 : index
      %c0_40 = arith.constant 0 : index
      %106 = vector.load %arg9[%c0_39, %c0_40] : memref<66x4xf32, #tpu.memory_space<vmem>>, vector<1x4xf32>
      tpu.vector_store %arg9[%c0_39, %c0_40], %105 {strides = array<i32>} : memref<66x4xf32, #tpu.memory_space<vmem>>, vector<1x4xf32>,
      %cst_41 = arith.constant 0.000000e+00 : f32
      %107 = vector.broadcast %cst_41 : f32 to vector<1x4xf32>
      %c65 = arith.constant 65 : index
      %c0_42 = arith.constant 0 : index
      %108 = vector.load %arg9[%c65, %c0_42] : memref<66x4xf32, #tpu.memory_space<vmem>>, vector<1x4xf32>
      tpu.vector_store %arg9[%c65, %c0_42], %107 {strides = array<i32>} : memref<66x4xf32, #tpu.memory_space<vmem>>, vector<1x4xf32>,
      %cst_43 = arith.constant 0.000000e+00 : f32
      %109 = vector.broadcast %cst_43 : f32 to vector<2x128xf32>
      %c0_44 = arith.constant 0 : index
      %c0_45 = arith.constant 0 : index
      %110 = vector.load %arg7[%c0_44, %c0_45] : memref<2x128xf32, #tpu.memory_space<vmem>>, vector<2x128xf32>
      tpu.vector_store %arg7[%c0_44, %c0_45], %109 {strides = array<i32>} : memref<2x128xf32, #tpu.memory_space<vmem>>, vector<2x128xf32>,
    } else {
    }
    %c0 = arith.constant 0 : index
    %c0_1 = arith.constant 0 : index
    %c0_2 = arith.constant 0 : index
    %3 = vector.load %arg1[%c0, %c0_1, %c0_2] : memref<1x66x4xbf16, #tpu.memory_space<vmem>>, vector<1x66x4xbf16>
    %4 = vector.shape_cast %3 : vector<1x66x4xbf16> to vector<66x4xbf16>
    %5 = arith.extf %4 : vector<66x4xbf16> to vector<66x4xf32>
    %6 = vector.extract_strided_slice %5 {offsets = [1, 0], sizes = [64, 4], strides = [1, 1]} : vector<66x4xf32> to vector<64x4xf32>
    %7 = arith.truncf %6 : vector<64x4xf32> to vector<64x4xbf16>
    %c0_3 = arith.constant 0 : index
    %c0_4 = arith.constant 0 : index
    %8 = vector.load %arg2[%c0_3, %c0_4] : memref<4x32xbf16, #tpu.memory_space<vmem>>, vector<4x32xbf16>
    %cst = arith.constant dense<0.000000e+00> : vector<64x32xf32>
    %9 = tpu.matmul %7, %8, %cst {dimension_numbers = #tpu.dot_dimension_numbers<[1], [0], [0], [1], [0, 0, 1, 1], [], []>} : vector<64x4xbf16>, vector<4x32xbf16>, vector<64x32xf32> -> vector<64x32xf32>
    %c0_5 = arith.constant 0 : index
    %c0_6 = arith.constant 0 : index
    %10 = vector.load %arg3[%c0_5, %c0_6] : memref<1x32xf32, #tpu.memory_space<vmem>>, vector<1x32xf32>
    %11 = vector.broadcast %10 : vector<1x32xf32> to vector<64x32xf32>
    %12 = arith.addf %9, %11 : vector<64x32xf32>
    %c19 = arith.constant 19 : index
    %c0_7 = arith.constant 0 : index
    %13 = vector.load %arg8[%c19, %c0_7] : memref<102x32xf32, #tpu.memory_space<vmem>>, vector<64x32xf32>
    tpu.vector_store %arg8[%c19, %c0_7], %12 {strides = array<i32>} : memref<102x32xf32, #tpu.memory_space<vmem>>, vector<64x32xf32>,
    %c0_8 = arith.constant 0 : index
    %c0_9 = arith.constant 0 : index
    %14 = vector.load %arg8[%c0_8, %c0_9] : memref<102x32xf32, #tpu.memory_space<vmem>>, vector<102x32xf32>
    %15 = vector.extract_strided_slice %14 {offsets = [0, 0], sizes = [64, 32], strides = [1, 1]} : vector<102x32xf32> to vector<64x32xf32>
    %16 = vector.extract_strided_slice %14 {offsets = [1, 0], sizes = [64, 32], strides = [1, 1]} : vector<102x32xf32> to vector<64x32xf32>
    %17 = vector.extract_strided_slice %14 {offsets = [2, 0], sizes = [64, 32], strides = [1, 1]} : vector<102x32xf32> to vector<64x32xf32>
    %18 = vector.extract_strided_slice %14 {offsets = [3, 0], sizes = [64, 32], strides = [1, 1]} : vector<102x32xf32> to vector<64x32xf32>
    %19 = vector.extract_strided_slice %14 {offsets = [4, 0], sizes = [64, 32], strides = [1, 1]} : vector<102x32xf32> to vector<64x32xf32>
    %20 = vector.extract_strided_slice %14 {offsets = [5, 0], sizes = [64, 32], strides = [1, 1]} : vector<102x32xf32> to vector<64x32xf32>
    %21 = vector.extract_strided_slice %14 {offsets = [6, 0], sizes = [64, 32], strides = [1, 1]} : vector<102x32xf32> to vector<64x32xf32>
    %22 = vector.extract_strided_slice %14 {offsets = [7, 0], sizes = [64, 32], strides = [1, 1]} : vector<102x32xf32> to vector<64x32xf32>
    %23 = vector.extract_strided_slice %14 {offsets = [8, 0], sizes = [64, 32], strides = [1, 1]} : vector<102x32xf32> to vector<64x32xf32>
    %24 = vector.extract_strided_slice %14 {offsets = [9, 0], sizes = [64, 32], strides = [1, 1]} : vector<102x32xf32> to vector<64x32xf32>
    %25 = vector.extract_strided_slice %14 {offsets = [10, 0], sizes = [64, 32], strides = [1, 1]} : vector<102x32xf32> to vector<64x32xf32>
    %26 = vector.extract_strided_slice %14 {offsets = [11, 0], sizes = [64, 32], strides = [1, 1]} : vector<102x32xf32> to vector<64x32xf32>
    %27 = vector.extract_strided_slice %14 {offsets = [12, 0], sizes = [64, 32], strides = [1, 1]} : vector<102x32xf32> to vector<64x32xf32>
    %28 = vector.extract_strided_slice %14 {offsets = [13, 0], sizes = [64, 32], strides = [1, 1]} : vector<102x32xf32> to vector<64x32xf32>
    %29 = vector.extract_strided_slice %14 {offsets = [14, 0], sizes = [64, 32], strides = [1, 1]} : vector<102x32xf32> to vector<64x32xf32>
    %30 = vector.extract_strided_slice %14 {offsets = [15, 0], sizes = [64, 32], strides = [1, 1]} : vector<102x32xf32> to vector<64x32xf32>
    %31 = vector.extract_strided_slice %14 {offsets = [16, 0], sizes = [64, 32], strides = [1, 1]} : vector<102x32xf32> to vector<64x32xf32>
    %32 = vector.extract_strided_slice %14 {offsets = [17, 0], sizes = [64, 32], strides = [1, 1]} : vector<102x32xf32> to vector<64x32xf32>
    %33 = vector.extract_strided_slice %14 {offsets = [18, 0], sizes = [64, 32], strides = [1, 1]} : vector<102x32xf32> to vector<64x32xf32>
    %34 = vector.extract_strided_slice %14 {offsets = [19, 0], sizes = [64, 32], strides = [1, 1]} : vector<102x32xf32> to vector<64x32xf32>
    %35 = vector.extract_strided_slice %14 {offsets = [20, 0], sizes = [64, 32], strides = [1, 1]} : vector<102x32xf32> to vector<64x32xf32>
    %36 = vector.extract_strided_slice %14 {offsets = [21, 0], sizes = [64, 32], strides = [1, 1]} : vector<102x32xf32> to vector<64x32xf32>
    %37 = vector.extract_strided_slice %14 {offsets = [22, 0], sizes = [64, 32], strides = [1, 1]} : vector<102x32xf32> to vector<64x32xf32>
    %38 = vector.extract_strided_slice %14 {offsets = [23, 0], sizes = [64, 32], strides = [1, 1]} : vector<102x32xf32> to vector<64x32xf32>
    %39 = vector.extract_strided_slice %14 {offsets = [24, 0], sizes = [64, 32], strides = [1, 1]} : vector<102x32xf32> to vector<64x32xf32>
    %40 = vector.extract_strided_slice %14 {offsets = [25, 0], sizes = [64, 32], strides = [1, 1]} : vector<102x32xf32> to vector<64x32xf32>
    %41 = vector.extract_strided_slice %14 {offsets = [26, 0], sizes = [64, 32], strides = [1, 1]} : vector<102x32xf32> to vector<64x32xf32>
    %42 = vector.extract_strided_slice %14 {offsets = [27, 0], sizes = [64, 32], strides = [1, 1]} : vector<102x32xf32> to vector<64x32xf32>
    %43 = vector.extract_strided_slice %14 {offsets = [28, 0], sizes = [64, 32], strides = [1, 1]} : vector<102x32xf32> to vector<64x32xf32>
    %44 = vector.extract_strided_slice %14 {offsets = [29, 0], sizes = [64, 32], strides = [1, 1]} : vector<102x32xf32> to vector<64x32xf32>
    %45 = vector.extract_strided_slice %14 {offsets = [30, 0], sizes = [64, 32], strides = [1, 1]} : vector<102x32xf32> to vector<64x32xf32>
    %46 = vector.extract_strided_slice %14 {offsets = [31, 0], sizes = [64, 32], strides = [1, 1]} : vector<102x32xf32> to vector<64x32xf32>
    %47 = vector.extract_strided_slice %14 {offsets = [32, 0], sizes = [64, 32], strides = [1, 1]} : vector<102x32xf32> to vector<64x32xf32>
    %48 = vector.extract_strided_slice %14 {offsets = [33, 0], sizes = [64, 32], strides = [1, 1]} : vector<102x32xf32> to vector<64x32xf32>
    %49 = vector.extract_strided_slice %14 {offsets = [34, 0], sizes = [64, 32], strides = [1, 1]} : vector<102x32xf32> to vector<64x32xf32>
    %50 = vector.extract_strided_slice %14 {offsets = [35, 0], sizes = [64, 32], strides = [1, 1]} : vector<102x32xf32> to vector<64x32xf32>
    %51 = vector.extract_strided_slice %14 {offsets = [36, 0], sizes = [64, 32], strides = [1, 1]} : vector<102x32xf32> to vector<64x32xf32>
    %52 = vector.extract_strided_slice %14 {offsets = [37, 0], sizes = [64, 32], strides = [1, 1]} : vector<102x32xf32> to vector<64x32xf32>
    %53 = vector.extract_strided_slice %14 {offsets = [38, 0], sizes = [64, 32], strides = [1, 1]} : vector<102x32xf32> to vector<64x32xf32>
    %54 = tpu.concatenate %15, %16, %17, %18, %19, %20, %21, %22, %23, %24, %25, %26, %27, %28, %29, %30 in 1 : vector<64x32xf32>, vector<64x32xf32>, vector<64x32xf32>, vector<64x32xf32>, vector<64x32xf32>, vector<64x32xf32>, vector<64x32xf32>, vector<64x32xf32>, vector<64x32xf32>, vector<64x32xf32>, vector<64x32xf32>, vector<64x32xf32>, vector<64x32xf32>, vector<64x32xf32>, vector<64x32xf32>, vector<64x32xf32> -> vector<64x512xf32>
    %55 = tpu.concatenate %31, %32, %33, %34, %35, %36, %37, %38, %39, %40, %41, %42, %43, %44, %45, %46 in 1 : vector<64x32xf32>, vector<64x32xf32>, vector<64x32xf32>, vector<64x32xf32>, vector<64x32xf32>, vector<64x32xf32>, vector<64x32xf32>, vector<64x32xf32>, vector<64x32xf32>, vector<64x32xf32>, vector<64x32xf32>, vector<64x32xf32>, vector<64x32xf32>, vector<64x32xf32>, vector<64x32xf32>, vector<64x32xf32> -> vector<64x512xf32>
    %56 = tpu.concatenate %47, %48, %49, %50, %51, %52, %53 in 1 : vector<64x32xf32>, vector<64x32xf32>, vector<64x32xf32>, vector<64x32xf32>, vector<64x32xf32>, vector<64x32xf32>, vector<64x32xf32> -> vector<64x224xf32>
    %57 = tpu.concatenate %54, %55, %56 in 1 : vector<64x512xf32>, vector<64x512xf32>, vector<64x224xf32> -> vector<64x1248xf32>
    %58 = tpu.iota {dimensions = array<i32: 0>} : vector<66x4xi32>
    %c1_i32 = arith.constant 1 : i32
    %59 = vector.broadcast %c1_i32 : i32 to vector<66x4xi32>
    %60 = arith.cmpi sge, %58, %59 : vector<66x4xi32>
    %c64_i32 = arith.constant 64 : i32
    %61 = vector.broadcast %c64_i32 : i32 to vector<66x4xi32>
    %62 = arith.cmpi sle, %58, %61 : vector<66x4xi32>
    %63 = arith.andi %60, %62 : vector<66x4xi1>
    %cst_10 = arith.constant 0xFF800000 : f32
    %64 = vector.broadcast %cst_10 : f32 to vector<66x4xf32>
    %65 = arith.select %63, %5, %64 : vector<66x4xi1>, vector<66x4xf32>
    %66 = vector.extract_strided_slice %65 {offsets = [0, 0], sizes = [64, 4], strides = [1, 1]} : vector<66x4xf32> to vector<64x4xf32>
    %67 = vector.extract_strided_slice %65 {offsets = [1, 0], sizes = [64, 4], strides = [1, 1]} : vector<66x4xf32> to vector<64x4xf32>
    %68 = arith.maximumf %66, %67 : vector<64x4xf32>
    %69 = vector.extract_strided_slice %65 {offsets = [2, 0], sizes = [64, 4], strides = [1, 1]} : vector<66x4xf32> to vector<64x4xf32>
    %70 = arith.maximumf %68, %69 : vector<64x4xf32>
    %c1 = arith.constant 1 : index
    %c0_11 = arith.constant 0 : index
    %71 = vector.load %arg9[%c1, %c0_11] : memref<66x4xf32, #tpu.memory_space<vmem>>, vector<64x4xf32>
    tpu.vector_store %arg9[%c1, %c0_11], %70 {strides = array<i32>} : memref<66x4xf32, #tpu.memory_space<vmem>>, vector<64x4xf32>,
    %c0_12 = arith.constant 0 : index
    %c0_13 = arith.constant 0 : index
    %72 = vector.load %arg9[%c0_12, %c0_13] : memref<66x4xf32, #tpu.memory_space<vmem>>, vector<66x4xf32>
    %73 = vector.extract_strided_slice %72 {offsets = [0, 0], sizes = [64, 4], strides = [1, 1]} : vector<66x4xf32> to vector<64x4xf32>
    %74 = vector.extract_strided_slice %72 {offsets = [1, 0], sizes = [64, 4], strides = [1, 1]} : vector<66x4xf32> to vector<64x4xf32>
    %75 = vector.extract_strided_slice %72 {offsets = [2, 0], sizes = [64, 4], strides = [1, 1]} : vector<66x4xf32> to vector<64x4xf32>
    %76 = vector.extract_strided_slice %5 {offsets = [0, 0], sizes = [64, 4], strides = [1, 1]} : vector<66x4xf32> to vector<64x4xf32>
    %77 = vector.extract_strided_slice %5 {offsets = [1, 0], sizes = [64, 4], strides = [1, 1]} : vector<66x4xf32> to vector<64x4xf32>
    %78 = vector.extract_strided_slice %5 {offsets = [2, 0], sizes = [64, 4], strides = [1, 1]} : vector<66x4xf32> to vector<64x4xf32>
    %79 = tpu.concatenate %73, %74, %75, %76, %77, %78 in 1 : vector<64x4xf32>, vector<64x4xf32>, vector<64x4xf32>, vector<64x4xf32>, vector<64x4xf32>, vector<64x4xf32> -> vector<64x24xf32>
    %80 = arith.truncf %57 : vector<64x1248xf32> to vector<64x1248xbf16>
    %c0_14 = arith.constant 0 : index
    %c0_15 = arith.constant 0 : index
    %81 = vector.load %arg4[%c0_14, %c0_15] : memref<1248x128xbf16, #tpu.memory_space<vmem>>, vector<1248x128xbf16>
    %cst_16 = arith.constant dense<0.000000e+00> : vector<64x128xf32>
    %82 = tpu.matmul %80, %81, %cst_16 {dimension_numbers = #tpu.dot_dimension_numbers<[1], [0], [0], [1], [0, 0, 1, 1], [], []>} : vector<64x1248xbf16>, vector<1248x128xbf16>, vector<64x128xf32> -> vector<64x128xf32>
    %83 = arith.truncf %79 : vector<64x24xf32> to vector<64x24xbf16>
    %c0_17 = arith.constant 0 : index
    %c0_18 = arith.constant 0 : index
    %84 = vector.load %arg5[%c0_17, %c0_18] : memref<24x128xbf16, #tpu.memory_space<vmem>>, vector<24x128xbf16>
    %cst_19 = arith.constant dense<0.000000e+00> : vector<64x128xf32>
    %85 = tpu.matmul %83, %84, %cst_19 {dimension_numbers = #tpu.dot_dimension_numbers<[1], [0], [0], [1], [0, 0, 1, 1], [], []>} : vector<64x24xbf16>, vector<24x128xbf16>, vector<64x128xf32> -> vector<64x128xf32>
    %86 = arith.addf %82, %85 : vector<64x128xf32>
    %c0_20 = arith.constant 0 : index
    %c0_21 = arith.constant 0 : index
    %c0_22 = arith.constant 0 : index
    %87 = vector.load %arg6[%c0_20, %c0_21, %c0_22] : memref<1x64x128xf32, #tpu.memory_space<vmem>>, vector<1x64x128xf32>
    %88 = vector.shape_cast %87 : vector<1x64x128xf32> to vector<64x128xf32>
    %89 = vector.shape_cast %86 : vector<64x128xf32> to vector<1x64x128xf32>
    tpu.vector_store %arg6[%c0_20, %c0_21, %c0_22], %89 {strides = array<i32>} : memref<1x64x128xf32, #tpu.memory_space<vmem>>, vector<1x64x128xf32>,
    %c0_23 = arith.constant 0 : index
    %c0_24 = arith.constant 0 : index
    %90 = vector.load %arg7[%c0_23, %c0_24] : memref<2x128xf32, #tpu.memory_space<vmem>>, vector<1x128xf32>
    %cst_25 = arith.constant dense<0.000000e+00> : vector<128xf32>
    %91 = vector.multi_reduction <add>, %86, %cst_25 [0] : vector<64x128xf32> to vector<128xf32>
    %92 = vector.shape_cast %91 : vector<128xf32> to vector<1x128xf32>
    %93 = arith.addf %90, %92 : vector<1x128xf32>
    %c0_26 = arith.constant 0 : index
    %c0_27 = arith.constant 0 : index
    %94 = vector.load %arg7[%c0_26, %c0_27] : memref<2x128xf32, #tpu.memory_space<vmem>>, vector<1x128xf32>
    tpu.vector_store %arg7[%c0_26, %c0_27], %93 {strides = array<i32>} : memref<2x128xf32, #tpu.memory_space<vmem>>, vector<1x128xf32>,
    %c1_28 = arith.constant 1 : index
    %c0_29 = arith.constant 0 : index
    %95 = vector.load %arg7[%c1_28, %c0_29] : memref<2x128xf32, #tpu.memory_space<vmem>>, vector<1x128xf32>
    %96 = arith.mulf %86, %86 : vector<64x128xf32>
    %cst_30 = arith.constant dense<0.000000e+00> : vector<128xf32>
    %97 = vector.multi_reduction <add>, %96, %cst_30 [0] : vector<64x128xf32> to vector<128xf32>
    %98 = vector.shape_cast %97 : vector<128xf32> to vector<1x128xf32>
    %99 = arith.addf %95, %98 : vector<1x128xf32>
    %c1_31 = arith.constant 1 : index
    %c0_32 = arith.constant 0 : index
    %100 = vector.load %arg7[%c1_31, %c0_32] : memref<2x128xf32, #tpu.memory_space<vmem>>, vector<1x128xf32>
    tpu.vector_store %arg7[%c1_31, %c0_32], %99 {strides = array<i32>} : memref<2x128xf32, #tpu.memory_space<vmem>>, vector<1x128xf32>,
    return
  }
  func.func @transform_0(%arg0: i32) -> (i32, i32, i32) {
    %c0_i32 = arith.constant 0 : i32
    %c0_i32_0 = arith.constant 0 : i32
    %c0_i32_1 = arith.constant 0 : i32
    return %arg0, %c0_i32, %c0_i32_0 : i32, i32, i32
  }
  func.func @transform_1(%arg0: i32) -> (i32, i32) {
    %c0_i32 = arith.constant 0 : i32
    %c0_i32_0 = arith.constant 0 : i32
    %c0_i32_1 = arith.constant 0 : i32
    return %c0_i32, %c0_i32_0 : i32, i32
  }
  func.func @transform_2(%arg0: i32) -> (i32, i32) {
    %c0_i32 = arith.constant 0 : i32
    %c0_i32_0 = arith.constant 0 : i32
    %c0_i32_1 = arith.constant 0 : i32
    return %c0_i32, %c0_i32_0 : i32, i32
  }
  func.func @transform_3(%arg0: i32) -> (i32, i32) {
    %c0_i32 = arith.constant 0 : i32
    %c0_i32_0 = arith.constant 0 : i32
    %c0_i32_1 = arith.constant 0 : i32
    return %c0_i32, %c0_i32_0 : i32, i32
  }
  func.func @transform_4(%arg0: i32) -> (i32, i32) {
    %c0_i32 = arith.constant 0 : i32
    %c0_i32_0 = arith.constant 0 : i32
    %c0_i32_1 = arith.constant 0 : i32
    return %c0_i32, %c0_i32_0 : i32, i32
  }
  func.func @transform_5(%arg0: i32) -> (i32, i32, i32) {
    %c0_i32 = arith.constant 0 : i32
    %c0_i32_0 = arith.constant 0 : i32
    %c0_i32_1 = arith.constant 0 : i32
    return %arg0, %c0_i32, %c0_i32_0 : i32, i32, i32
  }
  func.func @transform_6(%arg0: i32) -> (i32, i32) {
    %c0_i32 = arith.constant 0 : i32
    %c0_i32_0 = arith.constant 0 : i32
    %c0_i32_1 = arith.constant 0 : i32
    return %c0_i32, %c0_i32_0 : i32, i32
  }
}

</mosaic_0001>

<bundles_post_ra>
// kernel: tpu_custom_call.1
= control target key start
LH: loop header
LB: loop body
LE: loop exit
PB: predicated region body
PF: predicated region fallthrough
CT: control target
= control target key end

     0   :  { %12 = vsyncpa [#allocation5], 0  ;;  %s4503_s0 = inlined_call_operand.vmem [shape: bf16[2,66,4], index: 0, kind: input, shape index: {}]   ;;  %s4504_s1 = inlined_call_operand.vmem [shape: bf16[4,32], index: 1, kind: input, shape index: {}]   ;;  %s4505_s2 = inlined_call_operand.vmem [shape: f32[1,32], index: 2, kind: input, shape index: {}]   ;;  %s4506_s3 = inlined_call_operand.hbm [shape: bf16[1248,128], index: 3, kind: input, shape index: {}]   ;;  %s4507_s4 = inlined_call_operand.vmem [shape: bf16[24,128], index: 4, kind: input, shape index: {}]   ;;  %s4508_s5 = inlined_call_operand.hbm [shape: f32[2,64,128], index: 5, kind: output, shape index: {0}]   ;;  %s4509_s6 = inlined_call_operand.hbm [shape: f32[2,128], index: 6, kind: output, shape index: {1}]  }
   0x1   :  { %13 = vsyncpa [#allocation6], 0 }
   0x2   :  { %15 = vsyncpa [#allocation6 + $0x1], 0 }
   0x3   :  { %16 = vsyncpa [#allocation9], 0  ;;  %s3494_s21 = smov 0   ;;  %s3496_s22 = smov 0  }
   0x4   :  { %s3498_s23 = smov 0   ;;  %s3500_s24 = smov 0  }
   0x5 LB: > { %s3515_s25 = sadd.s32 4294967295, %s3441_s24   ;;  %s2572_s26 = sadd.s32 4294967294, %s3441_s24   ;;  %s3441_s24 = sphi %s3500_s24, %s4531_s24   ;;  %s3437_s23 = sphi %s3498_s23, %s4530_s23   ;;  %s3433_s22 = sphi %s3496_s22, %s4529_s22   ;;  %s3429_s21 = sphi %s3494_s21, %s4528_s21  }
   0x6   : > { %s3519_s27 = sadd.s32 1, %s3441_s24   ;;  %s139_s28 = sadd.s32 1, %s3437_s23 }
   0x7   : > { %s136_s29 = ssub.s32 %s3441_s24, %s3519_s27  ;;  %p149_p0 = scmp.ne.s32.totalorder %s3437_s23, %s3433_s22 }
   0x8   : > { %p137_p1 = scmp.eq.s32.totalorder %s136_s29, 0  ;;  %p4510_p2 = scmp.eq.s32.totalorder %s3515_s25, 1 }
   0x9   : > { %p155_p3 = scmp.ne.s32.totalorder %s3433_s22, %s3429_s21  ;;  %p156_p4 = scmp.eq.s32.totalorder %s2572_s26, 1 }
   0xa   : > { %s3530_s30 = scalar_select %p137_p1, %s3437_s23, %s139_s28  }
   0xb   : > { %p3534_p5 = por %p4510_p2, %p149_p0  ;;  %p3538_p6 = por %p156_p4, %p155_p3 }
   0xc   : > { %p2573_p7 = scmp.ge.s32.totalorder %s3441_s24, 1  ;;  %p184_p8 = scmp.lt.s32.totalorder %s3441_s24, 3 }
   0xd   : > { %s4514_s7 = scalar_select %p3534_p5, 1, 0 }
   0xe   : > { %s4515_s8 = scalar_select %p3538_p6, 1, 0 }
   0xf   : > { %p4511_p10 = scmp.eq.s32.totalorder %s3515_s25, 0  ;;  %p3546_p11 = pnand %p2573_p7, %p184_p8 }
  0x10   : > { %s3443_s10 = smov [#allocation4]   ;;  %s3317_s15 = scalar_lea.hbm %s4506_s3, 9984 }
  0x11   : > { %s4516_s9 = scalar_select %p3546_p11, 1, 0 }
  0x12   : > { %s202_s11 = sshll.u32 %s3443_s10, 4  ;;  %p2893_p12 = pneg %p3546_p11  ;;  %s203_s11 = int_to_ptr.vmem [resolvable:$true] %s202_s11 }
  0x13   : > { %p3318_p0 = scmp.ne.s32.totalorder %s4506_s3, %s3317_s15  ;;  %p3324_p7 = scmp.lt.u32.totalorder %s3317_s15, %s4506_s3 }
  0x14   : > { %p3554_p13 = pnand %p4511_p10, %p2893_p12 }
  0x16   : > { %p3319_p1 = pneg %p3554_p13 }
  0x18   : > { %p3320_p3 = pnand %p3319_p1, %p3318_p0 }
  0x1a   : > { %p3321_p4 = pneg %p3320_p3 }
  0x1c   : > { %p3326_p8 = pnand %p3324_p7, %p3321_p4 }
  0x1e   : > { %3329 = shalt.err (!%p3326_p8)
}
  0x1f   : > { %s3330_s20 = scalar_lea.vmem %s203_s11, 9984  ;;  %p3338_p10 = scmp.lt.s32.totalorder %s203_s11, %s203_s11 }
  0x20   : > { %p3331_p12 = scmp.ne.s32.totalorder %s203_s11, %s3330_s20  ;;  %p3339_p6 = scmp.lt.s32.totalorder %s3330_s20, %s3330_s20 }
  0x22   : > { %p3333_p2 = pnand %p3331_p12, %p3319_p1  ;;  %p3340_p5 = por %p3339_p6, %p3338_p10 }
  0x24   : > { %p3334_p9 = pneg %p3333_p2 }
  0x26   : > { %p3341_p11 = pnand %p3340_p5, %p3334_p9 }
  0x28   : > { %3344 = shalt.err (!%p3341_p11)
}
  0x29   : > { %s3444_s26 = smov 64   ;;  %s3445_s28 = smov 4  }
  0x2a   : > { %2896 = dma.hbm_to_vmem [thread:$0]  (!%p3554_p13), %s4506_s3, 9984, %s203_s11, [#allocation5], %s3444_s26, %s3444_s26, %s3445_s28  }
  0x2b   : > { %p4518_p0 = scmp.ne.s32.totalorder %s4516_s9, 0 }
  0x2c   : > { %p4519_p3 = scmp.eq.s32.totalorder (!%p4518_p0), %s3515_s25, 0 }
  0x2d   : > { %229 = sbr.rel (%p4518_p0) target bundleno = 798 (0x31e), region = 40 }
  0x34   : > { %3416 = dma.done.wait (%p4519_p3), [#allocation5], 9984   ;;  %p4520_p2 = pmov %p4519_p3 }
  0x35   : > { %s254_s13 = sand.u32 1, %s3433_s22   ;;  %p259_p5 = scmp.lt.s32.totalorder %s3515_s25, 1 }
  0x36   : > { %3418 = vsyncadd (%p4520_p2), [#allocation5], 4294957312  ;;  %s2578_s12 = sshll.u32 %s254_s13, 6  ;;  %p4521_p6 = scmp.ne.s32.totalorder %s3515_s25, 0 }
  0x37   : > { %s260_s14 = scalar_select %p259_p5, %s3515_s25, 1 }
  0x38   : > { %s3590_s17 = scalar_lea.vmem [#allocation7], %s2578_s12  ;;  %268 = sbr.rel (%p4521_p6) target bundleno = 63 (0x3f), region = 48  ;;  %vm269_vm0 = vcmask (!%p4521_p6), 261120   ;;  %vm272_vm1 = vcmask (!%p4521_p6), 256000   ;;  %vm277_vm2 = vcmask (!%p4521_p6), 24576   ;;  %v3446_v0 = vmov (!%p4521_p6), 0.0  }
  0x39   : > { %s2882_s15 = smul.u32 36, %s260_s14  ;;  %270 = vst.msk [vmem:[#allocation2] sm:$0xff] (!%p4521_p6), %vm269_vm0, %v3446_v0  ;;  %271 = vst.msk [vmem:[#allocation2 + $0x8] sm:$0xff] (!%p4521_p6), %vm269_vm0, %v3446_v0 }
  0x3a   : > { %274 = vst.msk [vmem:[#allocation2 + $0x53] sm:$0xff] (!%p4521_p6), %vm269_vm0, %v3446_v0  ;;  %275 = vst.msk [vmem:[#allocation2 + $0x5b] sm:$0xff] (!%p4521_p6), %vm269_vm0, %v3446_v0 }
  0x3b   : > { %s3588_s9 = scalar_lea.vmem %s4503_s0, %s2882_s15  ;;  %280 = vst [vmem:[#allocation8] sm:$0x3] (!%p4521_p6), %v3446_v0  ;;  %273 = vst.msk [vmem:[#allocation2 + $0x10] sm:$0x7] (!%p4521_p6), %vm272_vm1, %v3446_v0 }
  0x3c   : > { %276 = vst.msk [vmem:[#allocation2 + $0x63] sm:$0x7] (!%p4521_p6), %vm272_vm1, %v3446_v0 }
  0x3d   : > { %278 = vst.msk [vmem:[#allocation3] sm:$0x1] (!%p4521_p6), %vm277_vm2, %v3446_v0  ;;  %279 = vst.msk [vmem:[#allocation3 + $0x41] sm:$0x1] (!%p4521_p6), %vm277_vm2, %v3446_v0 }
  0x3f PF: > { %v304_v1 = vld [vmem:[%s4504_s1] sm:$0x3]  ;;  %vm362_vm3 = vcmask 1041408   ;;  %v3601_v3 = vld [vmem:[%s3588_s9 + $0x8] sm:$0xff]   ;;  %vm349_vm4 = vcmask 31744   ;;  %v943_v4 = vlaneseq  ;;  %v285_v7 = vld [vmem:[%s3588_s9 + $0x10] sm:$0xff]  }
  0x40   : > { %v3598_v2 = vld [vmem:[%s3588_s9] sm:$0xff]   ;;  %2880 = vmatprep.subr.msk.bf16.mxu0 %vm362_vm3, %v304_v1  ;;  %v364_v5 = vsel %vm362_vm3, %v304_v1, 0  ;;  %v3606_v6 = vunpack.c.l.bf16 %v3601_v3  ;;  %vm312_vm5 = vsmask.f32 7424  ;;  %v3609_v8 = vunpack.c.l.bf16 %v285_v7  ;;  %v287_v14 = vld [vmem:[%s3588_s9 + $0x18] sm:$0xff]   ;;  %s3447_s20 = smov 12  }
  0x41   : > { %2859 = vmatpush3.bf16.msra.mxu0 %v364_v5  ;;  %v3611_v9 = vunpack.c.h.bf16 %v285_v7  ;;  %v314_v10 = vshrl.u32 %v3598_v2, 16  ;;  %v316_v11 = vshll.u32 %v3598_v2, 16  ;;  %v321_v12 = vshll.u32 %v3601_v3, 16  ;;  %v289_v28 = vld [vmem:[%s3588_s9 + $0x20] sm:$0x1]  ;;  %s3448_s26 = smov 16  }
  0x42   : > { %v325_v13 = vshrl.u32 %v3601_v3, 16  ;;  %v329_v15 = vshll.u32 %v285_v7, 16  ;;  %vm462_vm6 = vcmask 1046528   ;;  %vm504_vm7 = vcmask 1045504   ;;  %s3449_s28 = smov 20   ;;  %s3450_s29 = smov 4  }
  0x43   : > { %v1005_v16 = vrot.slane %v3609_v8, 1  ;;  %v318_v17 = vrot.slane %v316_v11, 1  ;;  %v323_v18 = vrot.slane %v321_v12, 1  ;;  %v1007_v19 = vrot.slane %v3611_v9, 1  ;;  %s3451_s10 = smov 8   ;;  %s3452_s18 = smov 32  }
  0x44   : > { %v1038_v20 = vrot.slane %v3609_v8, 2  ;;  %v331_v21 = vrot.slane %v329_v15, 1  ;;  %v1040_v22 = vrot.slane %v3611_v9, 2  ;;  %v3622_v23 = vunpack.c.l.bf16 %v287_v14  ;;  %s3453_s19 = smov 64   ;;  %s4439_s15 = scalar_lea.sflag [#allocation6], %s254_s13 }
  0x45   : > { %v3624_v24 = vunpack.c.h.bf16 %v287_v14  ;;  %v319_v25 = vor.u32 %v318_v17, %v314_v10  ;;  %v327_v26 = vor.u32 %v325_v13, %v323_v18  ;;  %v3629_v27 = vsel %vm462_vm6, %v1005_v16, %v1007_v19  ;;  %p4522_p10 = scmp.ne.s32.totalorder %s4514_s7, 0  ;;  %s3456_s16 = smov [#allocation7]  }
  0x46   : > { %v1027_v29 = vmax.f32 %v3609_v8, %v3629_v27  ;;  %v3637_v30 = vsel %vm504_vm7, %v1038_v20, %v1040_v22  ;;  %v333_v31 = vshrl.u32 %v285_v7, 16  ;;  %v1009_v32 = vrot.slane %v3622_v23, 1  ;;  %s3349_s9 = sshll.u32 %s3456_s16, 4  ;;  %s3350_s9 = int_to_ptr.vmem [resolvable:$false] %s3349_s9 }
  0x47   : > { %v324_v33 = vsel %vm312_vm5, %v319_v25, %v323_v18  ;;  %v332_v34 = vsel %vm312_vm5, %v327_v26, %v331_v21  ;;  %v337_v35 = vshll.u32 %v287_v14, 16  ;;  %v3643_v36 = vrot.slane %v3624_v24, 1 }
  0x48   : > { %2860 = vmatprep.mubr.msk.bf16.mxu0 %vm349_vm4, %v324_v33  ;;  %v1060_v37 = vmax.f32 %v1027_v29, %v3637_v30  ;;  %v335_v38 = vor.u32 %v333_v31, %v331_v21  ;;  %v3648_v39 = vsel %vm462_vm6, %v1007_v19, %v1009_v32  ;;  %v1042_v40 = vrot.slane %v3622_v23, 2 }
  0x49   : > { %2861 = vmatmul.mubr.msk.bf16.vlgmr.msra.gmra.mrb[0].mxu0 %vm349_vm4, %v332_v34  ;;  %v339_v41 = vrot.slane %v337_v35, 1  ;;  %v3654_v42 = vsel %vm462_vm6, %v1009_v32, %v3643_v36  ;;  %v1028_v43 = vmax.f32 %v3611_v9, %v3648_v39  ;;  %v3659_v44 = vrot.slane %v3624_v24, 2 }
  0x4a   : > { %1068 = vst.msk [vmem:[#allocation3 + $0x21] sm:$0xff] %vm349_vm4, %v1060_v37  ;;  %v1029_v45 = vmax.f32 %v3622_v23, %v3654_v42  ;;  %v3665_v46 = vsel %vm504_vm7, %v1040_v22, %v1042_v40  ;;  %v3667_v47 = vunpack.c.l.bf16 %v289_v28  ;;  %v2585_v48 = vcombine.low %v289_v28, %v289_v28 }
  0x4b   : > { %v340_v49 = vsel %vm312_vm5, %v335_v38, %v339_v41  ;;  %v3672_v50 = vsel %vm504_vm7, %v1042_v40, %v3659_v44  ;;  %v1061_v51 = vmax.f32 %v1028_v43, %v3665_v46  ;;  %v341_v52 = vshrl.u32 %v287_v14, 16 }
  0x4c   : > { %2864 = vmatprep.mubr.msk.bf16.mxu0 %vm349_vm4, %v340_v49  ;;  %v1062_v53 = vmax.f32 %v1029_v45, %v3672_v50  ;;  %v345_v54 = vshll.u32 %v2585_v48, 16  ;;  %v944_v55 = vshrl.u32 %v943_v4, 7  ;;  %v290_v56 = vunpack.c.l.bf16 %v3598_v2 }
  0x4d   : > { %1069 = vst.msk [vmem:[#allocation3 + $0x29] sm:$0xff] %vm349_vm4, %v1061_v51  ;;  %v343_v57 = vor.u32 %v341_v52, %v339_v41  ;;  %v291_v58 = vunpack.c.h.bf16 %v3598_v2  ;;  %v1001_v59 = vrot.slane %v3606_v6, 1  ;;  %v1034_v60 = vrot.slane %v3606_v6, 2 }
  0x4e   : > { %1070 = vst.msk [vmem:[#allocation3 + $0x31] sm:$0xff] %vm349_vm4, %v1062_v53  ;;  %v347_v61 = vrot.slane %v345_v54, 1  ;;  %v952_v62 = vadd.s32 64, %v944_v55  ;;  %vm953_vm8 = vcmp.ge.s32.totalorder %v944_v55, 1  ;;  %v1205_v63 = vrot.slane %v290_v56, 1 }
  0x4f   : > { %v2953_v0 = vpack.i.bf16 %v291_v58, %v290_v56  ;;  %v999_v1 = vrot.slane %v291_v58, 1  ;;  %v980_v4 = vsel %vm953_vm8, %v290_v56, -inf  ;;  %v1032_v5 = vrot.slane %v291_v58, 2 }
  0x50   : > { %v348_v7 = vsel %vm312_vm5, %v343_v57, %v347_v61  ;;  %vm970_vm9 = vcmp.le.s32.totalorder %v952_v62, 64  ;;  %v998_v10 = vrot.slane %v980_v4, 1  ;;  %v1246_v11 = vrot.slane %v290_v56, 2 }
  0x51   : > { %2865 = vmatmul.mubr.msk.bf16.gmra.mrb[4].mxu0 %vm349_vm4, %v348_v7  ;;  %v988_v2 = vsel %vm970_vm9, %v3667_v47, -inf  ;;  %2954 = vrot.lane.b32.xlu0 %v2953_v0, %s3447_s20  ;;  %v1002_v12 = vsel %vm462_vm6, %v999_v1, %v1001_v59  ;;  %v1207_v13 = vsel %vm462_vm6, %v1205_v63, %v999_v1  ;;  %v1035_v14 = vsel %vm504_vm7, %v1032_v5, %v1034_v60 }
  0x52   : > { %v1013_v15 = vrot.slane %v988_v2, 1  ;;  %v1046_v17 = vrot.slane %v988_v2, 2  ;;  %v1024_v18 = vmax.f32 %v291_v58, %v1002_v12  ;;  %v2963_v19 = vpack.i.bf16 %v1002_v12, %v1207_v13 }
  0x53   : > { %v1000_v21 = vsel %vm462_vm6, %v998_v10, %v999_v1  ;;  %v1248_v22 = vsel %vm504_vm7, %v1246_v11, %v1032_v5  ;;  %v1031_v25 = vrot.slane %v980_v4, 2  ;;  %v293_v26 = vunpack.c.h.bf16 %v3601_v3 }
  0x54   : > { %v1014_v28 = vsel %vm462_vm6, %v3643_v36, %v1013_v15  ;;  %v1047_v29 = vsel %vm504_vm7, %v3659_v44, %v1046_v17  ;;  %v1023_v31 = vmax.f32 %v980_v4, %v1000_v21  ;;  %v1057_v32 = vmax.f32 %v1024_v18, %v1035_v14  ;;  %v3715_v53 = vld [vmem:[#allocation3 + $0x28] sm:$0xff] }
  0x55   : > { %v1030_v33 = vmax.f32 %v3624_v24, %v1014_v28  ;;  %2964 = vrot.lane.b32.xlu0 %v2963_v19, %s3448_s26  ;;  %v2973_v34 = vpack.i.bf16 %v1035_v14, %v1248_v22  ;;  %v1033_v35 = vsel %vm504_vm7, %v1031_v25, %v1032_v5  ;;  %v1003_v37 = vrot.slane %v293_v26, 1 }
  0x56   : > { %1065 = vst.msk [vmem:[#allocation3 + $0x9] sm:$0xff] %vm349_vm4, %v1057_v32  ;;  %v1056_v3 = vmax.f32 %v1023_v31, %v1033_v35  ;;  %v1036_v38 = vrot.slane %v293_v26, 2  ;;  %v2958_v40 = vpack.i.bf16 %v293_v26, %v3606_v6  ;;  %v1140_v58 = vrot.slane %v3715_v53, 2 }
  0x57   : > { %v1063_v41 = vmax.f32 %v1030_v33, %v1047_v29  ;;  %v1006_v43 = vsel %vm462_vm6, %v1003_v37, %v1005_v16  ;;  %v1004_v45 = vsel %vm462_vm6, %v1001_v59, %v1003_v37  ;;  %v1220_v0 = vrot.slane %v3667_v47, 1 }
  0x58   : > { %1064 = vst.msk [vmem:[#allocation3 + $0x1] sm:$0xff] %vm349_vm4, %v1056_v3  ;;  %v1026_v48 = vmax.f32 %v293_v26, %v1006_v43  ;;  %v1039_v49 = vsel %vm504_vm7, %v1036_v38, %v1038_v20  ;;  %2959 = vrot.lane.b32.xlu1 %v2958_v40, %s3447_s20  ;;  %v1025_v51 = vmax.f32 %v3606_v6, %v1004_v45  ;;  %v3720_v20 = vld [vmem:[#allocation3 + $0x30] sm:$0xff]  ;;  %v1099_v6 = vrot.slane %v3715_v53, 1 }
  0x59   : > { %v1037_v52 = vsel %vm504_vm7, %v1034_v60, %v1036_v38  ;;  %1071 = vst.msk [vmem:[#allocation3 + $0x39] sm:$0xff] %vm349_vm4, %v1063_v41  ;;  %2974 = vrot.lane.b32.xlu0 %v2973_v34, %s3449_s28  ;;  %v2968_v16 = vpack.i.bf16 %v1006_v43, %v1004_v45  ;;  %v1101_v57 = vrot.slane %v3720_v20, 1  ;;  %v1142_v61 = vrot.slane %v3720_v20, 2 }
  0x5a   : > { %v1059_v54 = vmax.f32 %v1026_v48, %v1039_v49  ;;  %v1058_v55 = vmax.f32 %v1025_v51, %v1037_v52  ;;  %v2978_v56 = vpack.i.bf16 %v1039_v49, %v1037_v52  ;;  %v1261_v1 = vrot.slane %v3667_v47, 2 }
  0x5b   : > { %v1102_v31 = vsel %vm462_vm6, %v1099_v6, %v1101_v57  ;;  %v1143_v41 = vsel %vm504_vm7, %v1140_v58, %v1142_v61  ;;  %vm588_vm10 = vcmask 1043456   ;;  %vm1295_vm11 = vcmask 64512  }
  0x5c   : > { %1067 = vst.msk [vmem:[#allocation3 + $0x19] sm:$0xff] %vm349_vm4, %v1059_v54  ;;  %1066 = vst.msk [vmem:[#allocation3 + $0x11] sm:$0xff] %vm349_vm4, %v1058_v55  ;;  %2969 = vrot.lane.b32.xlu1 %v2968_v16, %s3448_s26  ;;  %vm1304_vm12 = vcmask 97280   ;;  %vm1313_vm13 = vcmask 130048   ;;  %vm1322_vm14 = vcmask 162816   ;;  %vm1528_vm15 = vcmask 195584  }
  0x5d   : > { %vm431_vm0 = vcmask 261120   ;;  %vm614_vm1 = vcmask 1042432   ;;  %vm546_vm2 = vcmask 1044480   ;;  %vm790_vm5 = vcmask 785408  }
  0x5f   : > { %v3725_v59 = vld [vmem:[#allocation3] sm:$0xff]  ;;  %v3727_v60 = vld [vmem:[#allocation3 + $0x8] sm:$0xff] }
  0x60   : > { %2979 = vrot.lane.b32.xlu1 %v2978_v56, %s3449_s28  ;;  %v1090_v62 = vrot.slane %v3725_v59, 1  ;;  %v3732_v63 = vld [vmem:[#allocation3 + $0x38] sm:$0xff]  ;;  %v1091_v4 = vrot.slane %v3727_v60, 1  ;;  %v1131_v5 = vrot.slane %v3725_v59, 2  ;;  %v1080_v7 = vld [vmem:[#allocation3 + $0x40] sm:$0x3] }
  0x61   : > { %v1132_v10 = vrot.slane %v3727_v60, 2  ;;  %v1103_v11 = vrot.slane %v3732_v63, 1  ;;  %v1105_v14 = vrot.slane %v1080_v7, 1  ;;  %v1144_v15 = vrot.slane %v3732_v63, 2 }
  0x62   : > { %v1146_v17 = vrot.slane %v1080_v7, 2  ;;  %v1092_v51 = vsel %vm462_vm6, %v1090_v62, %v1091_v4  ;;  %v1221_v62 = vsel %vm462_vm6, %v3643_v36, %v1220_v0 }
  0x63   : > { %v3740_v2 = vld [vmem:[#allocation3 + $0x10] sm:$0xff]  ;;  %v3742_v12 = vld [vmem:[#allocation3 + $0x18] sm:$0xff]  ;;  %v3744_v13 = vld [vmem:[#allocation3 + $0x20] sm:$0xff]  ;;  %v1133_v35 = vsel %vm504_vm7, %v1131_v5, %v1132_v10  ;;  %v1104_v45 = vsel %vm462_vm6, %v1101_v57, %v1103_v11  ;;  %v1106_v48 = vsel %vm462_vm6, %v1103_v11, %v1105_v14  ;;  %v1145_v54 = vsel %vm504_vm7, %v1142_v61, %v1144_v15 }
  0x64   : > { %v1093_v47 = vrot.slane %v3740_v2, 1  ;;  %v1095_v18 = vrot.slane %v3742_v12, 1  ;;  %v1097_v19 = vrot.slane %v3744_v13, 1  ;;  %v1138_v21 = vrot.slane %v3744_v13, 2 }
  0x65   : > { %v1134_v22 = vrot.slane %v3740_v2, 2  ;;  %v1136_v25 = vrot.slane %v3742_v12, 2  ;;  %v3018_v16 = vpack.i.bf16 %v1106_v48, %v1104_v45  ;;  %v1147_v55 = vsel %vm504_vm7, %v1144_v15, %v1146_v17 }
  0x66   : > { %v1096_v26 = vsel %vm462_vm6, %v1093_v47, %v1095_v18  ;;  %v1098_v28 = vsel %vm462_vm6, %v1095_v18, %v1097_v19  ;;  %v1100_v29 = vsel %vm462_vm6, %v1097_v19, %v1099_v6  ;;  %v1141_v40 = vsel %vm504_vm7, %v1138_v21, %v1140_v58 }
  0x67   : > { %v2983_v32 = vpack.i.bf16 %v1098_v28, %v1096_v26  ;;  %v1137_v33 = vsel %vm504_vm7, %v1134_v22, %v1136_v25  ;;  %v1139_v34 = vsel %vm504_vm7, %v1136_v25, %v1138_v21  ;;  %v1135_v37 = vsel %vm504_vm7, %v1132_v10, %v1134_v22 }
  0x68   : > { %v2993_v3 = vpack.i.bf16 %v1102_v31, %v1100_v29  ;;  %v2988_v38 = vpack.i.bf16 %v1139_v34, %v1137_v33  ;;  %v3013_v43 = vpack.i.bf16 %v1135_v37, %v1133_v35  ;;  %v2998_v49 = vpack.i.bf16 %v1143_v41, %v1141_v40 }
  0x69   : > { %2984 = vrot.lane.b32.xlu0 %v2983_v32, %s3450_s29  ;;  %v1094_v52 = vsel %vm462_vm6, %v1091_v4, %v1093_v47  ;;  %v3023_v56 = vpack.i.bf16 %v1147_v55, %v1145_v54  ;;  %v3008_v57 = vpack.i.bf16 %v3611_v9, %v3609_v8  ;;  %v3028_v58 = vpack.i.bf16 %v3624_v24, %v3622_v23 }
  0x6a   : > { %2989 = vrot.lane.b32.xlu1 %v2988_v38, %s3451_s10  ;;  %v3003_v6 = vpack.i.bf16 %v1094_v52, %v1092_v51  ;;  %v3033_v61 = vpack.i.bf16 %v3648_v39, %v3629_v27  ;;  %v3038_v4 = vpack.i.bf16 %v1221_v62, %v3654_v42  ;;  %v1262_v8 = vsel %vm504_vm7, %v3659_v44, %v1261_v1  ;;  %v3234_v38 = vld [vmem:[%s4507_s4 + $0x8] ss:$0 sps:$4 sm:$0xff]   ;;  %v3241_v52 = vld [vmem:[#allocation4 + $0x140] sm:$0xff]  }
  0x6b   : > { %v3043_v9 = vpack.i.bf16 %v3665_v46, %v3637_v30  ;;  %v3048_v23 = vpack.i.bf16 %v1262_v8, %v3672_v50  ;;  %2778 = vmatprep.subr.bf16.mxu0 %v3241_v52  ;;  %v3242_v52 = vld [vmem:[#allocation4 + $0x58] sm:$0xff]  }
  0x6d   : > { %2994 = vrot.lane.b32.xlu0 %v2993_v3, %s3450_s29  ;;  %v3233_v3 = vld [vmem:[%s4507_s4] sm:$0xff]  }
  0x6e   : > { %3014 = vrot.lane.b32.xlu1 %v3013_v43, %s3451_s10  ;;  %2868 = vmatprep.subr.bf16.mxu1 %v3233_v3 }
  0x6f   : > { %2869 = vmatpush3.bf16.msra.mxu1 %v3233_v3  ;;  %v3239_v3 = vld [vmem:[#allocation4 + $0x50] sm:$0xff]  }
  0x70   : > { %2881 = vmatprep.subr.msk.bf16.mxu1 %vm588_vm10, %v3234_v38 }
  0x71   : > { %2999 = vrot.lane.b32.xlu0 %v2998_v49, %s3451_s10 }
  0x72   : > { %3019 = vrot.lane.b32.xlu1 %v3018_v16, %s3450_s29 }
  0x75   : > { %3004 = vrot.lane.b32.xlu0 %v3003_v6, %s3450_s29 }
  0x76   : > { %3024 = vrot.lane.b32.xlu1 %v3023_v56, %s3451_s10 }
  0x79   : > { %3009 = vrot.lane.b32.xlu0 %v3008_v57, %s3447_s20  ;;  %v1542_v57 = vsel %vm588_vm10, %v3234_v38, 0 }
  0x7a   : > { %3029 = vrot.lane.b32.xlu1 %v3028_v58, %s3447_s20  ;;  %2871 = vmatpush3.bf16.msra.mxu1 %v1542_v57  ;;  %v3246_v57 = vld [vmem:[#allocation4 + $0x60] sm:$0xff]   ;;  %s3454_s20 = smov 96  }
  0x7d   : > { %3034 = vrot.lane.b32.xlu0 %v3033_v61, %s3448_s26  ;;  %v3235_v61 = vld [vmem:[#allocation4 + $0x40] sm:$0xff]  }
  0x7e   : > { %3039 = vrot.lane.b32.xlu1 %v3038_v4, %s3448_s26  ;;  %v3245_v4 = vld [vmem:[#allocation4 + $0x148] sm:$0xff]   ;;  %2698 = vmatprep.subr.bf16.mxu1 %v3235_v61  ;;  %s2686_s26 = sshll.u32 %s3515_s25, 10 }
  0x7f   : > { %s4431_s14 = scalar_lea.hbm %s4508_s5, %s2686_s26 }
  0x81   : > { %3044 = vrot.lane.b32.xlu0 %v3043_v9, %s3449_s28 }
  0x82   : > { %3049 = vrot.lane.b32.xlu1 %v3048_v23, %s3449_s28  ;;  %s2476_s28 = sshll.u32 %s3590_s17, 4  ;;  %s4434_s28 = int_to_ptr.vmem [resolvable:$true] %s2476_s28 }
  0x83   : > { %s3345_s11 = scalar_lea.vmem %s4434_s28, 1024  ;;  %p3352_p1 = scmp.lt.s32.totalorder %s4434_s28, %s3350_s9 }
  0x84   : > { %p3346_p9 = scmp.ne.s32.totalorder %s4434_s28, %s3345_s11 }
  0x86   : > { %p3347_p11 = pnand %p3346_p9, %p4522_p10 }
  0x88   : > { %p3348_p13 = pneg %p3347_p11 }
  0xc3   : > { %v3793_v24 = vpop.permute.xlu0 %2954 }
  0xc4   : > { %v2957_v50 = vunpack.i.h.bf16 %v3793_v24  ;;  %v2956_v5 = vunpack.i.l.bf16 %v3793_v24 }
  0xc7   : > { %v3795_v27 = vpop.permute.xlu0 %2964 }
  0xc8   : > { %v2967_v10 = vunpack.i.h.bf16 %v3795_v27  ;;  %v2966_v11 = vunpack.i.l.bf16 %v3795_v27 }
  0xca   : > { %v2960_v39 = vpop.permute.xlu1 %2959 }
  0xcb   : > { %v3797_v36 = vpop.permute.xlu0 %2974  ;;  %v2962_v26 = vunpack.i.h.bf16 %v2960_v39  ;;  %v2961_v29 = vunpack.i.l.bf16 %v2960_v39 }
  0xcc   : > { %v2977_v22 = vunpack.i.h.bf16 %v3797_v36  ;;  %v2976_v25 = vunpack.i.l.bf16 %v3797_v36 }
  0xce   : > { %v3799_v44 = vpop.permute.xlu1 %2969 }
  0xcf   : > { %v2972_v31 = vunpack.i.h.bf16 %v3799_v44 }
  0xd2   : > { %v3801_v1 = vpop.permute.xlu1 %2979 }
  0xd3   : > { %v2982_v32 = vunpack.i.h.bf16 %v3801_v1  ;;  %v2981_v40 = vunpack.i.l.bf16 %v3801_v1 }
  0xdb   : > { %v2985_v42 = vpop.permute.xlu0 %2984 }
  0xdc   : > { %v2987_v0 = vunpack.i.h.bf16 %v2985_v42  ;;  %v2986_v30 = vunpack.i.l.bf16 %v2985_v42  ;;  %v2990_v47 = vpop.permute.xlu1 %2989 }
  0xdd   : > { %v2992_v19 = vunpack.i.h.bf16 %v2990_v47  ;;  %v2991_v21 = vunpack.i.l.bf16 %v2990_v47 }
  0xde   : > { %v1290_v14 = vsel %vm349_vm4, %v3742_v12, %v2987_v0  ;;  %v1289_v15 = vsel %vm349_vm4, %v3740_v2, %v2986_v30  ;;  %v2971_v12 = vunpack.i.l.bf16 %v3799_v44 }
  0xdf   : > { %v2995_v46 = vpop.permute.xlu0 %2994  ;;  %v1298_v33 = vsel %vm1295_vm11, %v1289_v15, %v2991_v21  ;;  %v1299_v34 = vsel %vm1295_vm11, %v1290_v14, %v2992_v19 }
  0xe0   : > { %v2996_v7 = vunpack.i.l.bf16 %v2995_v46  ;;  %v2997_v18 = vunpack.i.h.bf16 %v2995_v46  ;;  %v3015_v37 = vpop.permute.xlu1 %3014  ;;  %v1307_v16 = vsel %vm1304_vm12, %v1298_v33, %v2961_v29  ;;  %v1308_v54 = vsel %vm1304_vm12, %v1299_v34, %v2962_v26  ;;  %v3238_v34 = vld [vmem:[#allocation4 + $0x8] sm:$0xff]  }
  0xe1   : > { %v3017_v49 = vunpack.i.h.bf16 %v3015_v37  ;;  %v3016_v51 = vunpack.i.l.bf16 %v3015_v37  ;;  %v1316_v39 = vsel %vm1313_vm13, %v1307_v16, %v2971_v12  ;;  %v1317_v30 = vsel %vm1313_vm13, %v1308_v54, %v2972_v31 }
  0xe2   : > { %v1291_v2 = vsel %vm349_vm4, %v3744_v13, %v2996_v7  ;;  %v1292_v13 = vsel %vm349_vm4, %v3715_v53, %v2997_v18  ;;  %v3243_v53 = vld [vmem:[#allocation4 + $0x100] sm:$0xff]  }
  0xe3   : > { %v3000_v17 = vpop.permute.xlu0 %2999  ;;  %2779 = vmatpush3.bf16.msra.mxu0 %v3243_v53 }
  0xe4   : > { %v3001_v28 = vunpack.i.l.bf16 %v3000_v17  ;;  %v3002_v41 = vunpack.i.h.bf16 %v3000_v17  ;;  %v3020_v58 = vpop.permute.xlu1 %3019  ;;  %2780 = vmatprep.subr.bf16.mxu0 %v3245_v4  ;;  %v3236_v17 = vld [vmem:[#allocation4] sm:$0xff]   ;;  %v2586_v4 = vld [vmem:[%s4505_s2] ss:$0 sm:$0xff] }
  0xe5   : > { %v3021_v36 = vunpack.i.l.bf16 %v3020_v58  ;;  %v3022_v0 = vunpack.i.h.bf16 %v3020_v58 }
  0xe6   : > { %v1300_v45 = vsel %vm1295_vm11, %v1291_v2, %v3001_v28 }
  0xe7   : > { %v3005_v35 = vpop.permute.xlu0 %3004  ;;  %v1293_v1 = vsel %vm349_vm4, %v3720_v20, %v3021_v36  ;;  %v1294_v20 = vsel %vm349_vm4, %v3732_v63, %v3022_v0  ;;  %v3248_v0 = vld [vmem:[#allocation4 + $0x20] sm:$0xff]  }
  0xe8   : > { %v3007_v43 = vunpack.i.h.bf16 %v3005_v35  ;;  %v3006_v48 = vunpack.i.l.bf16 %v3005_v35  ;;  %v3025_v7 = vpop.permute.xlu1 %3024 }
  0xe9   : > { %v3026_v15 = vunpack.i.l.bf16 %v3025_v7 }
  0xea   : > { %v1288_v55 = vsel %vm349_vm4, %v3727_v60, %v3007_v43  ;;  %v1287_v6 = vsel %vm349_vm4, %v3725_v59, %v3006_v48  ;;  %v1301_v60 = vsel %vm1295_vm11, %v1292_v13, %v3002_v41  ;;  %v3247_v59 = vld [vmem:[#allocation4 + $0x108] sm:$0xff]   ;;  %vm697_vm4 = vcmask 1040384  }
  0xeb   : > { %v1297_v56 = vsel %vm1295_vm11, %v1288_v55, %v3017_v49  ;;  %v3010_v62 = vpop.permute.xlu0 %3009  ;;  %v1296_v8 = vsel %vm1295_vm11, %v1287_v6, %v3016_v51  ;;  %2781 = vmatpush3.bf16.msra.mxu0 %v3247_v59  ;;  %v3240_v51 = vld [vmem:[#allocation4 + $0x10] sm:$0xff]  }
  0xec   : > { %v1306_v9 = vsel %vm1304_vm12, %v1297_v56, %v2957_v50  ;;  %v1305_v23 = vsel %vm1304_vm12, %v1296_v8, %v2956_v5  ;;  %v1325_v50 = vsel %vm1322_vm14, %v1316_v39, %v2981_v40  ;;  %v1326_v5 = vsel %vm1322_vm14, %v1317_v30, %v2982_v32  ;;  %v3030_v29 = vpop.permute.xlu1 %3029  ;;  %v3244_v56 = vld [vmem:[#allocation4 + $0x18] sm:$0xff]   ;;  %v3249_v30 = vld [vmem:[#allocation4 + $0x150] sm:$0xff]  }
  0xed   : > { %v1315_v24 = vsel %vm1313_vm13, %v1306_v9, %v2967_v10  ;;  %v1314_v42 = vsel %vm1313_vm13, %v1305_v23, %v2966_v11  ;;  %v1513_v14 = vpack.c.bf16 %v1326_v5, %v1325_v50  ;;  %v3027_v11 = vunpack.i.h.bf16 %v3025_v7  ;;  %2782 = vmatprep.subr.bf16.mxu0 %v3249_v30 }
  0xee   : > { %v1324_v44 = vsel %vm1322_vm14, %v1315_v24, %v2977_v22  ;;  %v1323_v46 = vsel %vm1322_vm14, %v1314_v42, %v2976_v25  ;;  %v3012_v47 = vunpack.i.h.bf16 %v3010_v62  ;;  %v3011_v18 = vunpack.i.l.bf16 %v3010_v62  ;;  %v3237_v22 = vld [vmem:[#allocation4 + $0x48] sm:$0xff]   ;;  %v3880_v42 = vld [vmem:[#allocation2] sm:$0xff] }
  0xef   : > { %v3035_v10 = vpop.permute.xlu0 %3034  ;;  %v1512_v27 = vpack.c.bf16 %v1324_v44, %v1323_v46  ;;  %v1302_v25 = vsel %vm1295_vm11, %v1293_v1, %v3026_v15  ;;  %v3032_v12 = vunpack.i.h.bf16 %v3030_v29  ;;  %v3031_v2 = vunpack.i.l.bf16 %v3030_v29  ;;  %v3882_v44 = vld [vmem:[#allocation2 + $0x8] sm:$0xff]  ;;  %v3250_v46 = vld [vmem:[#allocation4 + $0x68] sm:$0xff]  }
  0xf0   : > { %v3037_v19 = vunpack.i.h.bf16 %v3035_v10  ;;  %v3036_v21 = vunpack.i.l.bf16 %v3035_v10  ;;  %v1310_v26 = vsel %vm1304_vm12, %v1301_v60, %v3012_v47  ;;  %v1309_v28 = vsel %vm1304_vm12, %v1300_v45, %v3011_v18  ;;  %v3040_v13 = vpop.permute.xlu1 %3039  ;;  %v3251_v10 = vld [vmem:[#allocation4 + $0x110] sm:$0xff]  }
  0xf1   : > { %2872 = vmatprep.mubr.msk.bf16.mxu1 %vm1528_vm15, %v1512_v27  ;;  %v1303_v63 = vsel %vm1295_vm11, %v1294_v20, %v3027_v11  ;;  %v1311_v38 = vsel %vm1304_vm12, %v1302_v25, %v3031_v2  ;;  %v3042_v45 = vunpack.i.h.bf16 %v3040_v13  ;;  %v3041_v48 = vunpack.i.l.bf16 %v3040_v13  ;;  %2783 = vmatpush3.bf16.msra.mxu0 %v3251_v10  ;;  %v3253_v20 = vld [vmem:[#allocation4 + $0x158] sm:$0xff]   ;;  %v3254_v25 = vld [vmem:[#allocation4 + $0x70] sm:$0xff]  }
  0xf2   : > { %2873 = vmatmul.mubr.msk.bf16.vlgmr.msra.gmra.mrb[0].mxu1 %vm1528_vm15, %v1513_v14  ;;  %v1318_v32 = vsel %vm1313_vm13, %v1309_v28, %v3036_v21  ;;  %v1319_v33 = vsel %vm1313_vm13, %v1310_v26, %v3037_v19  ;;  %v1312_v43 = vsel %vm1304_vm12, %v1303_v63, %v3032_v12  ;;  %v463_v1 = vrot.slane %v3880_v42, 1  ;;  %v3255_v2 = vld [vmem:[#allocation4 + $0x118] sm:$0xff]   ;;  %2784 = vmatprep.subr.bf16.mxu0 %v3253_v20 }
  0xf3   : > { %v3045_v31 = vpop.permute.xlu0 %3044  ;;  %2699 = vmatpush3.bf16.msra.mxu1 %v3236_v17  ;;  %v1320_v16 = vsel %vm1313_vm13, %v1311_v38, %v3041_v48  ;;  %v1321_v54 = vsel %vm1313_vm13, %v1312_v43, %v3042_v45  ;;  %v464_v50 = vrot.slane %v3882_v44, 1  ;;  %v615_v5 = vrot.slane %v3880_v42, 5 }
  0xf4   : > { %v3047_v35 = vunpack.i.h.bf16 %v3045_v31  ;;  %v3046_v37 = vunpack.i.l.bf16 %v3045_v31  ;;  %2700 = vmatprep.subr.bf16.mxu1 %v3237_v22  ;;  %v3050_v55 = vpop.permute.xlu1 %3049  ;;  %v616_v7 = vrot.slane %v3882_v44, 5  ;;  %v505_v15 = vrot.slane %v3880_v42, 2  ;;  %v3252_v22 = vld [vmem:[#allocation4 + $0x28] sm:$0xff]  }
  0xf5   : > { %v3052_v53 = vunpack.i.h.bf16 %v3050_v55  ;;  %v3051_v6 = vunpack.i.l.bf16 %v3050_v55  ;;  %v506_v17 = vrot.slane %v3882_v44, 2  ;;  %v656_v19 = vrot.slane %v3880_v42, 6  ;;  %2785 = vmatpush3.bf16.msra.mxu0 %v3255_v2 }
  0xf6   : > { %v1327_v40 = vsel %vm1322_vm14, %v1318_v32, %v3046_v37  ;;  %v1328_v41 = vsel %vm1322_vm14, %v1319_v33, %v3047_v35  ;;  %v657_v21 = vrot.slane %v3882_v44, 6  ;;  %v465_v31 = vsel %vm462_vm6, %v463_v1, %v464_v50 }
  0xf7   : > { %v1514_v49 = vpack.c.bf16 %v1328_v41, %v1327_v40  ;;  %2701 = vmatpush3.bf16.msra.mxu1 %v3238_v34  ;;  %v1329_v58 = vsel %vm1322_vm14, %v1320_v16, %v3051_v6  ;;  %v1330_v62 = vsel %vm1322_vm14, %v1321_v54, %v3052_v53  ;;  %v617_v12 = vsel %vm614_vm1, %v615_v5, %v616_v7  ;;  %v3257_v16 = vld [vmem:[#allocation4 + $0x160] sm:$0xff]   ;;  %v3258_v54 = vld [vmem:[#allocation4 + $0x78] sm:$0xff]  }
  0xf8   : > { %2702 = vmatprep.subr.bf16.mxu1 %v3239_v3  ;;  %v1515_v61 = vpack.c.bf16 %v1330_v62, %v1329_v58  ;;  %v507_v35 = vsel %vm504_vm7, %v505_v15, %v506_v17  ;;  %v547_v3 = vrot.slane %v3880_v42, 3  ;;  %v658_v40 = vsel %vm362_vm3, %v656_v19, %v657_v21  ;;  %v3259_v58 = vld [vmem:[#allocation4 + $0x120] sm:$0xff]   ;;  %2786 = vmatprep.subr.bf16.mxu0 %v3257_v16 }
  0xf9   : > { %2876 = vmatprep.mubr.msk.bf16.mxu1 %vm1528_vm15, %v1514_v49  ;;  %v548_v41 = vrot.slane %v3882_v44, 3  ;;  %v699_v6 = vrot.slane %v3882_v44, 7  ;;  %2787 = vmatpush3.bf16.msra.mxu0 %v3259_v58 }
  0xfa   : > { %2877 = vmatmul.mubr.msk.bf16.gmra.mrb[4].mxu1 %vm1528_vm15, %v1515_v61 }
  0xfb   : > { %2703 = vmatpush3.bf16.msra.mxu1 %v3240_v51  ;;  %v698_v51 = vrot.slane %v3880_v42, 7  ;;  %v549_v62 = vsel %vm546_vm2, %v547_v3, %v548_v41 }
  0xfc   : > { %2704 = vmatprep.subr.bf16.mxu1 %v3242_v52  ;;  %v3256_v52 = vld [vmem:[#allocation4 + $0x30] sm:$0xff]  }
  0xff   : > { %2705 = vmatpush3.bf16.msra.mxu1 %v3244_v56 }
 0x100   : > { %2706 = vmatprep.subr.bf16.mxu1 %v3246_v57 }
 0x103   : > { %2707 = vmatpush3.bf16.msra.mxu1 %v3248_v0 }
 0x104   : > { %2708 = vmatprep.subr.bf16.mxu1 %v3250_v46 }
 0x107   : > { %2709 = vmatpush3.bf16.msra.mxu1 %v3252_v22 }
 0x108   : > { %2710 = vmatprep.subr.bf16.mxu1 %v3254_v25 }
 0x10b   : > { %2711 = vmatpush3.bf16.msra.mxu1 %v3256_v52 }
 0x10c   : > { %2712 = vmatprep.subr.bf16.mxu1 %v3258_v54 }
 0x11c   : > { %v2862_v60 = vpop.f32.mrb[0].mxu0 }
 0x11d   : > { %v409_v8 = vadd.f32 %v2862_v60, %v2586_v4  ;;  %v400_v9 = vpop.f32.mrb[1].mxu0  ;;  %v3261_v60 = vld [vmem:[#allocation4 + $0x168] sm:$0xff]  }
 0x11e   : > { %v401_v59 = vadd.f32 %v2586_v4, %v400_v9  ;;  %v2863_v23 = vpop.f32.mrb[2].mxu0  ;;  %2788 = vmatprep.subr.bf16.mxu0 %v3261_v60 }
 0x11f   : > { %434 = vst.msk [vmem:[#allocation2 + $0x23] sm:$0xff] %vm431_vm0, %v409_v8  ;;  %v412_v24 = vadd.f32 %v2863_v23, %v2586_v4  ;;  %v403_v36 = vpop.f32.mrb[3].mxu0 }
 0x120   : > { %432 = vst.msk [vmem:[#allocation2 + $0x13] sm:$0xff] %vm431_vm0, %v401_v59  ;;  %v404_v39 = vadd.f32 %v2586_v4, %v403_v36  ;;  %v700_v36 = vsel %vm697_vm4, %v698_v51, %v699_v6 }
 0x121   : > { %435 = vst.msk [vmem:[#allocation2 + $0x2b] sm:$0xff] %vm431_vm0, %v412_v24  ;;  %v3262_v24 = vld [vmem:[#allocation4 + $0x128] sm:$0xff]  }
 0x122   : > { %433 = vst.msk [vmem:[#allocation2 + $0x1b] sm:$0xff] %vm431_vm0, %v404_v39  ;;  %2789 = vmatpush3.bf16.msra.mxu0 %v3262_v24 }
 0x124   : > { %v2866_v27 = vpop.f32.mrb[4].mxu0 }
 0x125   : > { %v425_v14 = vadd.f32 %v2866_v27, %v2586_v4  ;;  %v416_v11 = vpop.f32.mrb[5].mxu0 }
 0x126   : > { %v417_v47 = vadd.f32 %v2586_v4, %v416_v11  ;;  %v2867_v18 = vpop.f32.mrb[6].mxu0 }
 0x127   : > { %438 = vst.msk [vmem:[#allocation2 + $0x43] sm:$0xff] %vm431_vm0, %v425_v14  ;;  %v428_v26 = vadd.f32 %v2867_v18, %v2586_v4  ;;  %v419_v28 = vpop.f32.mrb[7].mxu0  ;;  %v3895_v29 = vld [vmem:[#allocation2 + $0x10] sm:$0xff]  ;;  %v3264_v14 = vld [vmem:[#allocation4 + $0x130] sm:$0xff]   ;;  %v3265_v18 = vld [vmem:[#allocation4 + $0x178] sm:$0xff]  }
 0x128   : > { %436 = vst.msk [vmem:[#allocation2 + $0x33] sm:$0xff] %vm431_vm0, %v417_v47  ;;  %v420_v32 = vadd.f32 %v2586_v4, %v419_v28  ;;  %v466_v33 = vrot.slane %v3895_v29, 1  ;;  %v618_v34 = vrot.slane %v3895_v29, 5  ;;  %v508_v63 = vrot.slane %v3895_v29, 2  ;;  %v3260_v4 = vld [vmem:[#allocation4 + $0x38] sm:$0xff]  }
 0x129   : > { %439 = vst.msk [vmem:[#allocation2 + $0x4b] sm:$0xff] %vm431_vm0, %v428_v26  ;;  %v659_v37 = vrot.slane %v3895_v29, 6  ;;  %v3914_v43 = vld [vmem:[#allocation2 + $0x18] sm:$0xff]  ;;  %v550_v49 = vrot.slane %v3895_v29, 3  ;;  %v701_v56 = vrot.slane %v3895_v29, 7  ;;  %v3926_v57 = vld [vmem:[#allocation2 + $0x20] sm:$0xff]  ;;  %2713 = vmatpush3.bf16.msra.mxu1 %v3260_v4 }
 0x12a   : > { %437 = vst.msk [vmem:[#allocation2 + $0x3b] sm:$0xff] %vm431_vm0, %v420_v32  ;;  %v467_v38 = vsel %vm462_vm6, %v464_v50, %v466_v33  ;;  %v619_v13 = vsel %vm614_vm1, %v616_v7, %v618_v34  ;;  %v509_v55 = vsel %vm504_vm7, %v506_v17, %v508_v63  ;;  %v468_v61 = vrot.slane %v3914_v43, 1  ;;  %v3263_v50 = vld [vmem:[#allocation4 + $0x170] sm:$0xff]   ;;  %v3266_v28 = vld [vmem:[#allocation4 + $0x138] sm:$0xff]  }
 0x12b   : > { %v3058_v45 = vpack.i.bf16 %v467_v38, %v465_v31  ;;  %v3053_v48 = vpack.i.bf16 %v619_v13, %v617_v12  ;;  %v660_v53 = vsel %vm362_vm3, %v657_v21, %v659_v37  ;;  %v3068_v8 = vpack.i.bf16 %v509_v55, %v507_v35  ;;  %2790 = vmatprep.subr.bf16.mxu0 %v3263_v50  ;;  %v3986_v38 = vld [vmem:[#allocation2 + $0x28] sm:$0xff] }
 0x12c   : > { %v3063_v9 = vpack.i.bf16 %v660_v53, %v658_v40  ;;  %v551_v59 = vsel %vm546_vm2, %v548_v41, %v550_v49  ;;  %v470_v23 = vrot.slane %v3926_v57, 1  ;;  %v702_v39 = vsel %vm697_vm4, %v699_v6, %v701_v56  ;;  %2791 = vmatpush3.bf16.msra.mxu0 %v3264_v14 }
 0x12d   : > { %3059 = vrot.lane.b32.xlu1 %v3058_v45, %s3452_s18  ;;  %3054 = vrot.lane.b32.xlu0 %v3053_v48, %s3452_s18  ;;  %v620_v0 = vrot.slane %v3914_v43, 5  ;;  %v622_v30 = vrot.slane %v3926_v57, 5  ;;  %v3078_v46 = vpack.i.bf16 %v551_v59, %v549_v62  ;;  %v469_v1 = vsel %vm462_vm6, %v466_v33, %v468_v61 }
 0x12e   : > { %v3073_v5 = vpack.i.bf16 %v702_v39, %v700_v36  ;;  %v471_v7 = vsel %vm462_vm6, %v468_v61, %v470_v23  ;;  %v510_v10 = vrot.slane %v3914_v43, 2  ;;  %v512_v27 = vrot.slane %v3926_v57, 2  ;;  %2792 = vmatprep.subr.bf16.mxu0 %v3265_v18 }
 0x12f   : > { %v621_v11 = vsel %vm614_vm1, %v618_v34, %v620_v0  ;;  %v623_v15 = vsel %vm614_vm1, %v620_v0, %v622_v30  ;;  %v661_v17 = vrot.slane %v3914_v43, 6  ;;  %v663_v47 = vrot.slane %v3926_v57, 6  ;;  %v3978_v33 = vld [vmem:[#allocation2 + $0x30] sm:$0xff] }
 0x130   : > { %v3088_v19 = vpack.i.bf16 %v471_v7, %v469_v1  ;;  %v552_v21 = vrot.slane %v3914_v43, 3  ;;  %v3083_v22 = vpack.i.bf16 %v623_v15, %v621_v11  ;;  %v511_v20 = vsel %vm504_vm7, %v508_v63, %v510_v10  ;;  %v3267_v34 = vld [vmem:[#allocation4 + $0xc0] sm:$0xff]   ;;  %2793 = vmatpush3.bf16.msra.mxu0 %v3266_v28 }
 0x131   : > { %3069 = vrot.lane.b32.xlu1 %v3068_v8, %s3453_s19  ;;  %3064 = vrot.lane.b32.xlu0 %v3063_v9, %s3453_s19  ;;  %v513_v25 = vsel %vm504_vm7, %v510_v10, %v512_v27  ;;  %v554_v26 = vrot.slane %v3926_v57, 3  ;;  %v662_v31 = vsel %vm362_vm3, %v659_v37, %v661_v17  ;;  %v664_v12 = vsel %vm362_vm3, %v661_v17, %v663_v47  ;;  %v4016_v24 = vld [vmem:[#allocation2 + $0x38] sm:$0xff]  ;;  %v4018_v36 = vld [vmem:[#allocation2 + $0x40] sm:$0xff] }
 0x132   : > { %v703_v2 = vrot.slane %v3914_v43, 7  ;;  %v705_v32 = vrot.slane %v3926_v57, 7  ;;  %v3098_v63 = vpack.i.bf16 %v513_v25, %v511_v20  ;;  %v3093_v35 = vpack.i.bf16 %v664_v12, %v662_v31  ;;  %2738 = vmatprep.subr.bf16.mxu1 %v3267_v34 }
 0x133   : > { %v553_v37 = vsel %vm546_vm2, %v550_v49, %v552_v21  ;;  %v555_v3 = vsel %vm546_vm2, %v552_v21, %v554_v26  ;;  %v474_v41 = vrot.slane %v3978_v33, 1  ;;  %v626_v45 = vrot.slane %v3978_v33, 5 }
 0x134   : > { %v704_v13 = vsel %vm697_vm4, %v701_v56, %v703_v2  ;;  %v706_v40 = vsel %vm697_vm4, %v703_v2, %v705_v32  ;;  %v472_v48 = vrot.slane %v3986_v38, 1  ;;  %v624_v49 = vrot.slane %v3986_v38, 5 }
 0x135   : > { %3079 = vrot.lane.b32.xlu1 %v3078_v46, %s3454_s20  ;;  %3074 = vrot.lane.b32.xlu0 %v3073_v5, %s3454_s20  ;;  %v3108_v51 = vpack.i.bf16 %v555_v3, %v553_v37  ;;  %v3103_v52 = vpack.i.bf16 %v706_v40, %v704_v13  ;;  %v516_v16 = vrot.slane %v3978_v33, 2  ;;  %v667_v53 = vrot.slane %v3978_v33, 6 }
 0x136   : > { %v475_v54 = vsel %vm462_vm6, %v472_v48, %v474_v41  ;;  %v627_v55 = vsel %vm614_vm1, %v624_v49, %v626_v45  ;;  %v514_v6 = vrot.slane %v3986_v38, 2  ;;  %v473_v56 = vsel %vm462_vm6, %v470_v23, %v472_v48 }
 0x137   : > { %v625_v58 = vsel %vm614_vm1, %v622_v30, %v624_v49  ;;  %v665_v62 = vrot.slane %v3986_v38, 6  ;;  %v3118_v61 = vpack.i.bf16 %v475_v54, %v473_v56  ;;  %v558_v8 = vrot.slane %v3978_v33, 3  ;;  %v4069_v54 = vld [vmem:[#allocation2 + $0x50] sm:$0xff] }
 0x138   : > { %v3113_v4 = vpack.i.bf16 %v627_v55, %v625_v58  ;;  %v517_v60 = vsel %vm504_vm7, %v514_v6, %v516_v16  ;;  %v709_v59 = vrot.slane %v3978_v33, 7  ;;  %v515_v23 = vsel %vm504_vm7, %v512_v27, %v514_v6 }
 0x139   : > { %3089 = vrot.lane.b32.xlu1 %v3088_v19, %s3452_s18  ;;  %3084 = vrot.lane.b32.xlu0 %v3083_v22, %s3452_s18  ;;  %v668_v9 = vsel %vm362_vm3, %v665_v62, %v667_v53  ;;  %v556_v39 = vrot.slane %v3986_v38, 3  ;;  %v3128_v0 = vpack.i.bf16 %v517_v60, %v515_v23  ;;  %v666_v30 = vsel %vm362_vm3, %v663_v47, %v665_v62 }
 0x13a   : > { %v707_v46 = vrot.slane %v3986_v38, 7  ;;  %v3123_v1 = vpack.i.bf16 %v668_v9, %v666_v30  ;;  %v476_v5 = vrot.slane %v4016_v24, 1  ;;  %v478_v7 = vrot.slane %v4018_v36, 1 }
 0x13b   : > { %v559_v50 = vsel %vm546_vm2, %v556_v39, %v558_v8  ;;  %v628_v27 = vrot.slane %v4016_v24, 5  ;;  %v630_v14 = vrot.slane %v4018_v36, 5  ;;  %v557_v11 = vsel %vm546_vm2, %v554_v26, %v556_v39 }
 0x13c   : > { %v710_v10 = vsel %vm697_vm4, %v707_v46, %v709_v59  ;;  %v3138_v15 = vpack.i.bf16 %v559_v50, %v557_v11  ;;  %v708_v17 = vsel %vm697_vm4, %v705_v32, %v707_v46  ;;  %v518_v47 = vrot.slane %v4016_v24, 2 }
 0x13d   : > { %3099 = vrot.lane.b32.xlu1 %v3098_v63, %s3453_s19  ;;  %3094 = vrot.lane.b32.xlu0 %v3093_v35, %s3453_s19  ;;  %v3133_v18 = vpack.i.bf16 %v710_v10, %v708_v17  ;;  %v477_v19 = vsel %vm462_vm6, %v474_v41, %v476_v5  ;;  %v479_v21 = vsel %vm462_vm6, %v476_v5, %v478_v7  ;;  %v520_v22 = vrot.slane %v4018_v36, 2  ;;  %v4056_v35 = vld [vmem:[#allocation2 + $0x48] sm:$0xff]  ;;  %v4091_v10 = vld [vmem:[#allocation2 + $0x58] sm:$0xff] }
 0x13e   : > { %v629_v20 = vsel %vm614_vm1, %v626_v45, %v628_v27  ;;  %v631_v25 = vsel %vm614_vm1, %v628_v27, %v630_v14  ;;  %v669_v28 = vrot.slane %v4016_v24, 6  ;;  %v671_v26 = vrot.slane %v4018_v36, 6 }
 0x13f   : > { %v3148_v31 = vpack.i.bf16 %v479_v21, %v477_v19  ;;  %v519_v12 = vsel %vm504_vm7, %v516_v16, %v518_v47  ;;  %v3143_v2 = vpack.i.bf16 %v631_v25, %v629_v20  ;;  %v521_v32 = vsel %vm504_vm7, %v518_v47, %v520_v22 }
 0x140   : > { %v560_v34 = vrot.slane %v4016_v24, 3  ;;  %v562_v63 = vrot.slane %v4018_v36, 3  ;;  %v3455_v37 = vmov 0   ;;  %v670_v3 = vsel %vm362_vm3, %v667_v53, %v669_v28 }
 0x141   : > { %3109 = vrot.lane.b32.xlu1 %v3108_v51, %s3454_s20  ;;  %3104 = vrot.lane.b32.xlu0 %v3103_v52, %s3454_s20  ;;  %v672_v13 = vsel %vm362_vm3, %v669_v28, %v671_v26  ;;  %v711_v40 = vrot.slane %v4016_v24, 7  ;;  %v713_v41 = vrot.slane %v4018_v36, 7  ;;  %v3158_v45 = vpack.i.bf16 %v521_v32, %v519_v12 }
 0x142   : > { %2349 = vmatprep.subr.bf16.mxu0 %v3455_v37  ;;  %v745_v48 = vrot.slane %v4056_v35, 2  ;;  %v3153_v49 = vpack.i.bf16 %v672_v13, %v670_v3  ;;  %v561_v51 = vsel %vm546_vm2, %v558_v8, %v560_v34  ;;  %v563_v52 = vsel %vm546_vm2, %v560_v34, %v562_v63 }
 0x143   : > { %v763_v16 = vrot.slane %v4056_v35, 6  ;;  %v712_v55 = vsel %vm697_vm4, %v709_v59, %v711_v40  ;;  %v714_v53 = vsel %vm697_vm4, %v711_v40, %v713_v41  ;;  %v740_v6 = vrot.slane %v4056_v35, 1 }
 0x144   : > { %v758_v56 = vrot.slane %v4056_v35, 5  ;;  %v3168_v58 = vpack.i.bf16 %v563_v52, %v561_v51  ;;  %v746_v62 = vsel %vm504_vm7, %v520_v22, %v745_v48  ;;  %v848_v8 = vrot.slane %v4069_v54, 5  ;;  %v4103_v22 = vld [vmem:[#allocation2 + $0x60] sm:$0x3f] }
 0x145   : > { %3119 = vrot.lane.b32.xlu1 %v3118_v61, %s3452_s18  ;;  %3114 = vrot.lane.b32.xlu0 %v3113_v4, %s3452_s18  ;;  %v830_v61 = vrot.slane %v4069_v54, 1  ;;  %v3163_v4 = vpack.i.bf16 %v714_v53, %v712_v55  ;;  %v764_v60 = vsel %vm362_vm3, %v671_v26, %v763_v16  ;;  %v750_v9 = vrot.slane %v4056_v35, 3 }
 0x146   : > { %v741_v59 = vsel %vm462_vm6, %v478_v7, %v740_v6  ;;  %v759_v23 = vsel %vm614_vm1, %v630_v14, %v758_v56  ;;  %v768_v39 = vrot.slane %v4056_v35, 7  ;;  %v840_v5 = vrot.slane %v4069_v54, 3 }
 0x147   : > { %v831_v30 = vsel %vm462_vm6, %v740_v6, %v830_v61  ;;  %v3173_v46 = vpack.i.bf16 %v741_v59, %v759_v23  ;;  %v751_v50 = vsel %vm546_vm2, %v562_v63, %v750_v9  ;;  %v858_v27 = vrot.slane %v4069_v54, 7 }
 0x148   : > { %v769_v7 = vsel %vm697_vm4, %v713_v41, %v768_v39  ;;  %v835_v14 = vrot.slane %v4069_v54, 2  ;;  %v853_v11 = vrot.slane %v4069_v54, 6  ;;  %v887_v17 = vrot.slane %v4091_v10, 6 }
 0x149   : > { %3129 = vrot.lane.b32.xlu1 %v3128_v0, %s3453_s19  ;;  %3124 = vrot.lane.b32.xlu0 %v3123_v1, %s3453_s19  ;;  %v3178_v0 = vpack.i.bf16 %v746_v62, %v764_v60  ;;  %v849_v1 = vsel %vm614_vm1, %v758_v56, %v848_v8  ;;  %v864_v19 = vrot.slane %v4091_v10, 1  ;;  %v882_v21 = vrot.slane %v4091_v10, 5 }
 0x14a   : > { %v3183_v47 = vpack.i.bf16 %v831_v30, %v849_v1  ;;  %v841_v20 = vsel %vm546_vm2, %v750_v9, %v840_v5  ;;  %v859_v25 = vsel %vm697_vm4, %v768_v39, %v858_v27  ;;  %v836_v28 = vsel %vm504_vm7, %v745_v48, %v835_v14 }
 0x14b   : > { %v854_v26 = vsel %vm362_vm3, %v763_v16, %v853_v11  ;;  %v928_v12 = vrot.slane %v4103_v22, 5  ;;  %v874_v34 = vrot.slane %v4091_v10, 3  ;;  %v892_v63 = vrot.slane %v4091_v10, 7 }
 0x14c   : > { %v3193_v32 = vpack.i.bf16 %v836_v28, %v854_v26  ;;  %v888_v13 = vsel %vm362_vm3, %v853_v11, %v887_v17  ;;  %v865_v40 = vsel %vm462_vm6, %v830_v61, %v864_v19  ;;  %v883_v41 = vsel %vm614_vm1, %v848_v8, %v882_v21 }
 0x14d   : > { %3139 = vrot.lane.b32.xlu1 %v3138_v15, %s3454_s20  ;;  %3134 = vrot.lane.b32.xlu0 %v3133_v18, %s3454_s20  ;;  %v869_v15 = vrot.slane %v4091_v10, 2  ;;  %v3188_v18 = vpack.i.bf16 %v751_v50, %v769_v7  ;;  %v929_v48 = vsel %vm614_vm1, %v882_v21, %v928_v12  ;;  %v933_v51 = vrot.slane %v4103_v22, 6 }
 0x14e   : > { %v3203_v16 = vpack.i.bf16 %v865_v40, %v883_v41  ;;  %v875_v55 = vsel %vm546_vm2, %v840_v5, %v874_v34  ;;  %v893_v53 = vsel %vm697_vm4, %v858_v27, %v892_v63  ;;  %v920_v62 = vrot.slane %v4103_v22, 3 }
 0x14f   : > { %v870_v3 = vsel %vm504_vm7, %v835_v14, %v869_v15  ;;  %v3213_v61 = vpack.i.bf16 %v875_v55, %v893_v53  ;;  %v589_v59 = vrot.slane %v3880_v42, 4  ;;  %v590_v23 = vrot.slane %v3882_v44, 4 }
 0x150   : > { %v3208_v52 = vpack.i.bf16 %v870_v3, %v888_v13  ;;  %v921_v60 = vsel %vm546_vm2, %v874_v34, %v920_v62  ;;  %v592_v39 = vrot.slane %v3895_v29, 4 }
 0x151   : > { %3149 = vrot.lane.b32.xlu1 %v3148_v31, %s3452_s18  ;;  %3144 = vrot.lane.b32.xlu0 %v3143_v2, %s3452_s18  ;;  %v910_v31 = vrot.slane %v4103_v22, 1  ;;  %v3198_v2 = vpack.i.bf16 %v841_v20, %v859_v25  ;;  %v591_v7 = vsel %vm588_vm10, %v589_v59, %v590_v23 }
 0x155   : > { %3159 = vrot.lane.b32.xlu1 %v3158_v45, %s3453_s19  ;;  %3154 = vrot.lane.b32.xlu0 %v3153_v49, %s3453_s19  ;;  %v911_v45 = vsel %vm462_vm6, %v864_v19, %v910_v31  ;;  %v915_v49 = vrot.slane %v4103_v22, 2 }
 0x156   : > { %v3218_v6 = vpack.i.bf16 %v929_v48, %v911_v45 }
 0x157   : > { %v916_v56 = vsel %vm504_vm7, %v869_v15, %v915_v49  ;;  %v3268_v49 = vld [vmem:[#allocation4 + $0x80] sm:$0xff]  }
 0x159   : > { %3169 = vrot.lane.b32.xlu1 %v3168_v58, %s3454_s20  ;;  %3164 = vrot.lane.b32.xlu0 %v3163_v4, %s3454_s20  ;;  %v934_v58 = vsel %vm362_vm3, %v887_v17, %v933_v51  ;;  %v593_v17 = vsel %vm588_vm10, %v590_v23, %v592_v39  ;;  %vm781_vm3 = vcmask 523264   ;;  %v3270_v51 = vld [vmem:[#allocation4 + $0xc8] sm:$0xff]  }
 0x15a   : > { %v3223_v4 = vpack.i.bf16 %v934_v58, %v916_v56 }
 0x15d   : > { %3179 = vrot.lane.b32.xlu1 %v3178_v0, %s3453_s19  ;;  %3174 = vrot.lane.b32.xlu0 %v3173_v46, %s3452_s18 }
 0x161   : > { %3184 = vrot.lane.b32.xlu1 %v3183_v47, %s3452_s18  ;;  %3189 = vrot.lane.b32.xlu0 %v3188_v18, %s3454_s20 }
 0x165   : > { %3199 = vrot.lane.b32.xlu1 %v3198_v2, %s3454_s20  ;;  %3194 = vrot.lane.b32.xlu0 %v3193_v32, %s3453_s19 }
 0x169   : > { %3209 = vrot.lane.b32.xlu1 %v3208_v52, %s3453_s19  ;;  %3204 = vrot.lane.b32.xlu0 %v3203_v16, %s3452_s18  ;;  %v594_v52 = vrot.slane %v3914_v43, 4  ;;  %v596_v16 = vrot.slane %v3926_v57, 4 }
 0x16b   : > { %v595_v23 = vsel %vm588_vm10, %v592_v39, %v594_v52 }
 0x16d   : > { %3214 = vrot.lane.b32.xlu0 %v3213_v61, %s3454_s20  ;;  %3219 = vrot.lane.b32.xlu1 %v3218_v6, %s3452_s18  ;;  %v3271_v61 = vld [vmem:[#allocation4 + $0x88] sm:$0xff]   ;;  %s3351_s18 = scalar_lea.vmem %s3350_s9, 2048 }
 0x16e   : > { %p3353_p4 = scmp.lt.s32.totalorder %s3351_s18, %s3345_s11 }
 0x170   : > { %p3354_p7 = por %p3353_p4, %p3352_p1 }
 0x171   : > { %3224 = vrot.lane.b32.xlu0 %v3223_v4, %s3453_s19  ;;  %922 = vrot.lane.b32.xlu1 %v921_v60, %s3454_s20  ;;  %v3273_v4 = vld [vmem:[#allocation4 + $0xd0] sm:$0xff]  }
 0x172   : > { %p3355_p8 = pnand %p3354_p7, %p3348_p13 }
 0x19f   : > { %v3060_v8 = vpop.permute.xlu1 %3059  ;;  %v3055_v9 = vpop.permute.xlu0 %3054 }
 0x1a0   : > { %v3062_v0 = vunpack.i.h.bf16 %v3060_v8  ;;  %v3061_v30 = vunpack.i.l.bf16 %v3060_v8  ;;  %v3057_v46 = vunpack.i.h.bf16 %v3055_v9  ;;  %v3056_v1 = vunpack.i.l.bf16 %v3055_v9 }
 0x1a2   : > { %v774_v47 = vsel %vm431_vm0, %v3882_v44, %v3062_v0  ;;  %v773_v18 = vsel %vm431_vm0, %v3880_v42, %v3061_v30  ;;  %v800_v19 = vsel %vm431_vm0, %v593_v17, %v3057_v46  ;;  %v799_v21 = vsel %vm431_vm0, %v591_v7, %v3056_v1  ;;  %v3276_v17 = vld [vmem:[#allocation4 + $0xd8] sm:$0xff]  }
 0x1a3   : > { %v3070_v50 = vpop.permute.xlu1 %3069  ;;  %v3065_v5 = vpop.permute.xlu0 %3064  ;;  %v597_v0 = vsel %vm588_vm10, %v594_v52, %v596_v16  ;;  %v3272_v52 = vld [vmem:[#allocation4 + $0x208] sm:$0xff]  }
 0x1a4   : > { %v3072_v27 = vunpack.i.h.bf16 %v3070_v50  ;;  %v3071_v14 = vunpack.i.l.bf16 %v3070_v50  ;;  %v3067_v11 = vunpack.i.h.bf16 %v3065_v5  ;;  %v3066_v15 = vunpack.i.l.bf16 %v3065_v5 }
 0x1a6   : > { %v782_v2 = vsel %vm781_vm3, %v773_v18, %v3071_v14  ;;  %v783_v32 = vsel %vm781_vm3, %v774_v47, %v3072_v27  ;;  %v807_v34 = vsel %vm781_vm3, %v799_v21, %v3066_v15  ;;  %v808_v44 = vsel %vm781_vm3, %v800_v19, %v3067_v11  ;;  %v3274_v27 = vld [vmem:[#allocation4 + $0x90] sm:$0xff]  }
 0x1a7   : > { %v3080_v20 = vpop.permute.xlu1 %3079  ;;  %v3075_v25 = vpop.permute.xlu0 %3074 }
 0x1a8   : > { %v3082_v28 = vunpack.i.h.bf16 %v3080_v20  ;;  %v3081_v26 = vunpack.i.l.bf16 %v3080_v20  ;;  %v3077_v31 = vunpack.i.h.bf16 %v3075_v25  ;;  %v3076_v12 = vunpack.i.l.bf16 %v3075_v25 }
 0x1aa   : > { %v791_v42 = vsel %vm790_vm5, %v782_v2, %v3081_v26  ;;  %v4154_v63 = vsel %vm790_vm5, %v783_v32, %v3082_v28  ;;  %v815_v3 = vsel %vm790_vm5, %v807_v34, %v3076_v12  ;;  %v4158_v13 = vsel %vm790_vm5, %v808_v44, %v3077_v31  ;;  %v3277_v2 = vld [vmem:[#allocation4 + $0x98] sm:$0xff]   ;;  %v3269_v32 = vld [vmem:[#allocation4 + $0x200] sm:$0xff]  }
 0x1ab   : > { %v1331_v40 = vpack.c.bf16 %v4154_v63, %v791_v42  ;;  %v3090_v41 = vpop.permute.xlu1 %3089  ;;  %v3085_v45 = vpop.permute.xlu0 %3084  ;;  %v1332_v48 = vpack.c.bf16 %v4158_v13, %v815_v3  ;;  %v3279_v34 = vld [vmem:[#allocation4 + $0xe0] sm:$0xff]   ;;  %v598_v44 = vrot.slane %v3986_v38, 4  ;;  %v600_v42 = vrot.slane %v3978_v33, 4 }
 0x1ac   : > { %v3092_v55 = vunpack.i.h.bf16 %v3090_v41  ;;  %v3091_v53 = vunpack.i.l.bf16 %v3090_v41  ;;  %v3087_v6 = vunpack.i.h.bf16 %v3085_v45  ;;  %v3086_v56 = vunpack.i.l.bf16 %v3085_v45 }
 0x1ad   : > { %2121 = vmatprep.mubr.bf16.mxu1 %v1332_v48 }
 0x1ae   : > { %2122 = vmatmul.mubr.bf16.vlgmr.msra.gmra.mrb[8].mxu1 %v1331_v40  ;;  %v776_v30 = vsel %vm431_vm0, %v3914_v43, %v3092_v55  ;;  %v775_v46 = vsel %vm431_vm0, %v3895_v29, %v3091_v53  ;;  %v802_v1 = vsel %vm431_vm0, %v597_v0, %v3087_v6  ;;  %v801_v50 = vsel %vm431_vm0, %v595_v23, %v3086_v56  ;;  %v3282_v55 = vld [vmem:[#allocation4 + $0xe8] sm:$0xff]  }
 0x1af   : > { %v3100_v58 = vpop.permute.xlu1 %3099  ;;  %v3095_v62 = vpop.permute.xlu0 %3094  ;;  %2739 = vmatpush3.bf16.msra.mxu1 %v3268_v49  ;;  %v3283_v0 = vld [vmem:[#allocation4 + $0xa8] sm:$0xff]  }
 0x1b0   : > { %2740 = vmatprep.subr.bf16.mxu1 %v3270_v51  ;;  %v3102_v60 = vunpack.i.h.bf16 %v3100_v58  ;;  %v3101_v8 = vunpack.i.l.bf16 %v3100_v58  ;;  %v3097_v9 = vunpack.i.h.bf16 %v3095_v62  ;;  %v3096_v59 = vunpack.i.l.bf16 %v3095_v62  ;;  %v3280_v51 = vld [vmem:[#allocation4 + $0xa0] sm:$0xff]  }
 0x1b1   : > { %v599_v62 = vsel %vm588_vm10, %v596_v16, %v598_v44 }
 0x1b2   : > { %v784_v47 = vsel %vm781_vm3, %v775_v46, %v3101_v8  ;;  %v785_v43 = vsel %vm781_vm3, %v776_v30, %v3102_v60  ;;  %v809_v29 = vsel %vm781_vm3, %v801_v50, %v3096_v59  ;;  %v810_v18 = vsel %vm781_vm3, %v802_v1, %v3097_v9  ;;  %v3275_v50 = vld [vmem:[#allocation4 + $0x210] sm:$0xff]  }
 0x1b3   : > { %v3110_v5 = vpop.permute.xlu1 %3109  ;;  %v3105_v7 = vpop.permute.xlu0 %3104  ;;  %2741 = vmatpush3.bf16.msra.mxu1 %v3271_v61  ;;  %v601_v61 = vsel %vm588_vm10, %v598_v44, %v600_v42 }
 0x1b4   : > { %v3112_v14 = vunpack.i.h.bf16 %v3110_v5  ;;  %v3111_v39 = vunpack.i.l.bf16 %v3110_v5  ;;  %v3107_v11 = vunpack.i.h.bf16 %v3105_v7  ;;  %v3106_v15 = vunpack.i.l.bf16 %v3105_v7  ;;  %2742 = vmatprep.subr.bf16.mxu1 %v3273_v4  ;;  %v3285_v5 = vld [vmem:[#allocation4 + $0xf0] sm:$0xff]  }
 0x1b6   : > { %v4179_v19 = vsel %vm790_vm5, %v809_v29, %v3106_v15  ;;  %v4182_v21 = vsel %vm790_vm5, %v810_v18, %v3107_v11  ;;  %v4185_v20 = vsel %vm790_vm5, %v784_v47, %v3111_v39  ;;  %v4188_v25 = vsel %vm790_vm5, %v785_v43, %v3112_v14  ;;  %v3278_v18 = vld [vmem:[#allocation4 + $0x218] sm:$0xff]  }
 0x1b7   : > { %v3120_v28 = vpop.permute.xlu1 %3119  ;;  %v3115_v26 = vpop.permute.xlu0 %3114  ;;  %v1336_v31 = vpack.c.bf16 %v4182_v21, %v4179_v19  ;;  %v1335_v12 = vpack.c.bf16 %v4188_v25, %v4185_v20  ;;  %2743 = vmatpush3.bf16.msra.mxu1 %v3274_v27 }
 0x1b8   : > { %2744 = vmatprep.subr.bf16.mxu1 %v3276_v17  ;;  %v3122_v3 = vunpack.i.h.bf16 %v3120_v28  ;;  %v3121_v40 = vunpack.i.l.bf16 %v3120_v28  ;;  %v3117_v41 = vunpack.i.h.bf16 %v3115_v26  ;;  %v3116_v45 = vunpack.i.l.bf16 %v3115_v26  ;;  %v3286_v28 = vld [vmem:[#allocation4 + $0xb0] sm:$0xff]   ;;  %v3288_v26 = vld [vmem:[#allocation4 + $0xf8] sm:$0xff]  }
 0x1b9   : > { %2129 = vmatprep.mubr.bf16.mxu1 %v1336_v31  ;;  %2251 = vmatprep.mubr.bf16.mxu0 %v1336_v31 }
 0x1ba   : > { %2130 = vmatmul.mubr.bf16.gmra.mrb[12].mxu1 %v1335_v12  ;;  %2252 = vmatmul.mubr.bf16.vlgmr.msra.gmra.mrb[8].mxu0 %v1335_v12  ;;  %v778_v4 = vsel %vm431_vm0, %v3986_v38, %v3122_v3  ;;  %v777_v60 = vsel %vm431_vm0, %v3926_v57, %v3121_v40  ;;  %v804_v8 = vsel %vm431_vm0, %v601_v61, %v3117_v41  ;;  %v602_v12 = vrot.slane %v4016_v24, 4 }
 0x1bb   : > { %v3130_v48 = vpop.permute.xlu1 %3129  ;;  %v3125_v49 = vpop.permute.xlu0 %3124  ;;  %2745 = vmatpush3.bf16.msra.mxu1 %v3277_v2  ;;  %2350 = vmatpush1.bf16.msra.mxu0 %v3269_v32  ;;  %v803_v9 = vsel %vm431_vm0, %v599_v62, %v3116_v45  ;;  %v604_v2 = vrot.slane %v4018_v36, 4  ;;  %v3281_v45 = vld [vmem:[#allocation4 + $0x220] sm:$0xff]  }
 0x1bc   : > { %2746 = vmatprep.subr.bf16.mxu1 %v3279_v34  ;;  %v3132_v53 = vunpack.i.h.bf16 %v3130_v48  ;;  %v3131_v6 = vunpack.i.l.bf16 %v3130_v48  ;;  %v3127_v56 = vunpack.i.h.bf16 %v3125_v49  ;;  %v3126_v58 = vunpack.i.l.bf16 %v3125_v49  ;;  %2351 = vmatprep.subr.bf16.mxu0 %v3455_v37  ;;  %v3289_v48 = vld [vmem:[#allocation4 + $0xb8] sm:$0xff]  }
 0x1be   : > { %v786_v38 = vsel %vm781_vm3, %v777_v60, %v3131_v6  ;;  %v787_v57 = vsel %vm781_vm3, %v778_v4, %v3132_v53  ;;  %v4212_v7 = vsel %vm781_vm3, %v803_v9, %v3126_v58  ;;  %v4215_v27 = vsel %vm781_vm3, %v804_v8, %v3127_v56 }
 0x1bf   : > { %v3140_v59 = vpop.permute.xlu1 %3139  ;;  %v3135_v23 = vpop.permute.xlu0 %3134  ;;  %2747 = vmatpush3.bf16.msra.mxu1 %v3280_v51  ;;  %2352 = vmatpush1.bf16.msra.mxu0 %v3272_v52  ;;  %v603_v6 = vsel %vm588_vm10, %v600_v42, %v602_v12  ;;  %v605_v56 = vsel %vm588_vm10, %v602_v12, %v604_v2 }
 0x1c0   : > { %v3142_v16 = vunpack.i.h.bf16 %v3140_v59  ;;  %v3141_v30 = vunpack.i.l.bf16 %v3140_v59  ;;  %v3137_v46 = vunpack.i.h.bf16 %v3135_v23  ;;  %v3136_v1 = vunpack.i.l.bf16 %v3135_v23  ;;  %2748 = vmatprep.subr.bf16.mxu1 %v3282_v55  ;;  %2353 = vmatprep.subr.bf16.mxu0 %v3455_v37  ;;  %v3291_v55 = vld [vmem:[#allocation4 + $0x1c0] sm:$0xff]   ;;  %v3284_v23 = vld [vmem:[#allocation4 + $0x228] sm:$0xff]  }
 0x1c2   : > { %v4220_v14 = vsel %vm790_vm5, %v4212_v7, %v3136_v1  ;;  %v4224_v39 = vsel %vm790_vm5, %v4215_v27, %v3137_v46  ;;  %v4227_v11 = vsel %vm790_vm5, %v786_v38, %v3141_v30  ;;  %v4230_v15 = vsel %vm790_vm5, %v787_v57, %v3142_v16 }
 0x1c3   : > { %v3150_v17 = vpop.permute.xlu1 %3149  ;;  %v3145_v47 = vpop.permute.xlu0 %3144  ;;  %v1341_v43 = vpack.c.bf16 %v4224_v39, %v4220_v14  ;;  %v4236_v29 = vpack.c.bf16 %v4230_v15, %v4227_v11  ;;  %2749 = vmatpush3.bf16.msra.mxu1 %v3283_v0  ;;  %2354 = vmatpush1.bf16.msra.mxu0 %v3275_v50 }
 0x1c4   : > { %2750 = vmatprep.subr.bf16.mxu1 %v3285_v5  ;;  %v3151_v31 = vunpack.i.l.bf16 %v3150_v17  ;;  %2355 = vmatprep.subr.bf16.mxu0 %v3455_v37  ;;  %v3152_v32 = vunpack.i.h.bf16 %v3150_v17  ;;  %v3147_v34 = vunpack.i.h.bf16 %v3145_v47  ;;  %v3146_v44 = vunpack.i.l.bf16 %v3145_v47  ;;  %v3287_v47 = vld [vmem:[#allocation4 + $0x230] sm:$0xff]  }
 0x1c5   : > { %2137 = vmatprep.mubr.bf16.mxu1 %v1341_v43  ;;  %2259 = vmatprep.mubr.bf16.mxu0 %v1341_v43  ;;  %v4285_v43 = vpop.f32.mrb[0].mxu1 }
 0x1c6   : > { %2138 = vmatmul.mubr.bf16.gmra.mrb[16].mxu1 %v4236_v29  ;;  %2260 = vmatmul.mubr.bf16.gmra.mrb[12].mxu0 %v4236_v29  ;;  %v779_v53 = vsel %vm431_vm0, %v3978_v33, %v3151_v31  ;;  %v780_v58 = vsel %vm431_vm0, %v4016_v24, %v3152_v32  ;;  %v806_v62 = vsel %vm431_vm0, %v605_v56, %v3147_v34  ;;  %v845_v31 = vrot.slane %v4069_v54, 4 }
 0x1c7   : > { %v3160_v3 = vpop.permute.xlu1 %3159  ;;  %v3155_v40 = vpop.permute.xlu0 %3154  ;;  %2356 = vmatpush1.bf16.msra.mxu0 %v3278_v18  ;;  %2751 = vmatpush3.bf16.msra.mxu1 %v3286_v28  ;;  %v805_v61 = vsel %vm431_vm0, %v603_v6, %v3146_v44  ;;  %v755_v18 = vrot.slane %v4056_v35, 4  ;;  %v1334_v28 = vpack.c.bf16 %v4179_v19, %v4158_v13 }
 0x1c8   : > { %v3161_v41 = vunpack.i.l.bf16 %v3160_v3  ;;  %v3162_v49 = vunpack.i.h.bf16 %v3160_v3  ;;  %v3157_v51 = vunpack.i.h.bf16 %v3155_v40  ;;  %v3156_v52 = vunpack.i.l.bf16 %v3155_v40  ;;  %2357 = vmatprep.subr.bf16.mxu0 %v3455_v37  ;;  %2752 = vmatprep.subr.bf16.mxu1 %v3288_v26  ;;  %v4290_v26 = vpop.f32.mrb[1].mxu1  ;;  %v3290_v40 = vld [vmem:[#allocation4 + $0x238] sm:$0xff]  }
 0x1c9   : > { %v4295_v12 = vpop.f32.mrb[2].mxu1  ;;  %v756_v19 = vsel %vm588_vm10, %v604_v2, %v755_v18 }
 0x1ca   : > { %v788_v4 = vsel %vm781_vm3, %v779_v53, %v3161_v41  ;;  %v789_v0 = vsel %vm781_vm3, %v780_v58, %v3162_v49  ;;  %v4259_v16 = vsel %vm781_vm3, %v805_v61, %v3156_v52  ;;  %v4262_v24 = vsel %vm781_vm3, %v806_v62, %v3157_v51  ;;  %v4298_v13 = vpop.f32.mrb[3].mxu1  ;;  %v3292_v62 = vld [vmem:[#allocation4 + $0x180] sm:$0xff]  }
 0x1cb   : > { %v3170_v60 = vpop.permute.xlu1 %3169  ;;  %v3165_v8 = vpop.permute.xlu0 %3164  ;;  %2358 = vmatpush1.bf16.msra.mxu0 %v3281_v45  ;;  %2753 = vmatpush3.bf16.msra.mxu1 %v3289_v48  ;;  %v1333_v48 = vpack.c.bf16 %v4185_v20, %v4154_v63  ;;  %v846_v52 = vsel %vm588_vm10, %v755_v18, %v845_v31 }
 0x1cc   : > { %v3172_v9 = vunpack.i.h.bf16 %v3170_v60  ;;  %v3171_v33 = vunpack.i.l.bf16 %v3170_v60  ;;  %v3167_v59 = vunpack.i.h.bf16 %v3165_v8  ;;  %v3166_v42 = vunpack.i.l.bf16 %v3165_v8  ;;  %2359 = vmatprep.subr.bf16.mxu0 %v3455_v37  ;;  %2818 = vmatprep.subr.bf16.mxu1 %v3291_v55  ;;  %v3293_v60 = vld [vmem:[#allocation4 + $0x240] sm:$0xff]   ;;  %v3294_v8 = vld [vmem:[#allocation4 + $0x1c8] sm:$0xff]  }
 0x1ce   : > { %v4267_v30 = vsel %vm790_vm5, %v4259_v16, %v3166_v42  ;;  %v4271_v46 = vsel %vm790_vm5, %v4262_v24, %v3167_v59  ;;  %v4274_v1 = vsel %vm790_vm5, %v788_v4, %v3171_v33  ;;  %v4277_v50 = vsel %vm790_vm5, %v789_v0, %v3172_v9  ;;  %v3295_v0 = vld [vmem:[#allocation4 + $0x188] sm:$0xff]  }
 0x1cf   : > { %v3180_v5 = vpop.permute.xlu1 %3179  ;;  %v3175_v38 = vpop.permute.xlu0 %3174  ;;  %v1346_v57 = vpack.c.bf16 %v4271_v46, %v4267_v30  ;;  %v4283_v17 = vpack.c.bf16 %v4277_v50, %v4274_v1  ;;  %2360 = vmatpush1.bf16.msra.mxu0 %v3284_v23 }
 0x1d0   : > { %2361 = vmatprep.subr.bf16.mxu0 %v3455_v37  ;;  %v3177_v32 = vunpack.i.h.bf16 %v3175_v38  ;;  %v3176_v34 = vunpack.i.l.bf16 %v3175_v38  ;;  %v3182_v49 = vunpack.i.h.bf16 %v3180_v5  ;;  %v3181_v51 = vunpack.i.l.bf16 %v3180_v5  ;;  %v3296_v38 = vld [vmem:[#allocation4 + $0x248] sm:$0xff]  }
 0x1d1   : > { %2145 = vmatprep.mubr.bf16.mxu1 %v1346_v57  ;;  %2267 = vmatprep.mubr.bf16.mxu0 %v1346_v57 }
 0x1d2   : > { %2146 = vmatmul.mubr.bf16.gmra.mrb[20].mxu1 %v4283_v17  ;;  %2268 = vmatmul.mubr.bf16.gmra.mrb[16].mxu0 %v4283_v17  ;;  %v823_v55 = vsel %vm431_vm0, %v4018_v36, %v3177_v32  ;;  %v826_v53 = vsel %vm431_vm0, %v756_v19, %v3176_v34  ;;  %v4318_v36 = vpack.c.bf16 %v4220_v14, %v4182_v21  ;;  %v4344_v32 = vpop.f32.mrb[4].mxu1  ;;  %v3298_v34 = vld [vmem:[#allocation4 + $0x190] sm:$0xff]   ;;  %v3300_v19 = vld [vmem:[#allocation4 + $0x1d8] sm:$0xff]  }
 0x1d3   : > { %v3185_v44 = vpop.permute.xlu1 %3184  ;;  %v3190_v3 = vpop.permute.xlu0 %3189  ;;  %2186 = vmatprep.mubr.bf16.mxu1 %v1334_v28  ;;  %2362 = vmatpush1.bf16.msra.mxu0 %v3287_v47  ;;  %v4322_v42 = vsel %vm781_vm3, %v826_v53, %v3181_v51  ;;  %v824_v21 = vsel %vm781_vm3, %v823_v55, %v3182_v49  ;;  %v3297_v47 = vld [vmem:[#allocation4 + $0x1d0] sm:$0xff]   ;;  %v3304_v49 = vld [vmem:[#allocation4 + $0x1a0] sm:$0xff]   ;;  %v3306_v51 = vld [vmem:[#allocation4 + $0x1e8] sm:$0xff]  }
 0x1d4   : > { %v3187_v41 = vunpack.i.h.bf16 %v3185_v44  ;;  %v3186_v45 = vunpack.i.l.bf16 %v3185_v44  ;;  %2363 = vmatprep.subr.bf16.mxu0 %v3455_v37  ;;  %v3192_v6 = vunpack.i.h.bf16 %v3190_v3  ;;  %v3191_v2 = vunpack.i.l.bf16 %v3190_v3  ;;  %v3307_v55 = vld [vmem:[#allocation4 + $0x1a8] sm:$0xff]  }
 0x1d5   : > { %v1340_v44 = vpack.c.bf16 %v4215_v27, %v4212_v7  ;;  %v1337_v3 = vpack.c.bf16 %v4227_v11, %v4188_v25  ;;  %v3301_v25 = vld [vmem:[#allocation4 + $0x198] sm:$0xff]   ;;  %v3303_v11 = vld [vmem:[#allocation4 + $0x1e0] sm:$0xff]  }
 0x1d6   : > { %v897_v9 = vsel %vm431_vm0, %v4056_v35, %v3187_v41  ;;  %v900_v33 = vsel %vm431_vm0, %v846_v52, %v3186_v45  ;;  %v828_v5 = vsel %vm790_vm5, %v4322_v42, %v3191_v2  ;;  %v825_v57 = vsel %vm790_vm5, %v824_v21, %v3192_v6  ;;  %v4350_v41 = vpop.f32.mrb[5].mxu1  ;;  %v3302_v27 = vld [vmem:[#allocation4 + $0x258] sm:$0xff]   ;;  %v3308_v6 = vld [vmem:[#allocation4 + $0x268] sm:$0xff]   ;;  %v3309_v2 = vld [vmem:[#allocation4 + $0x1f0] sm:$0xff]  }
 0x1d7   : > { %v3200_v56 = vpop.permute.xlu1 %3199  ;;  %v3195_v58 = vpop.permute.xlu0 %3194  ;;  %2364 = vmatpush1.bf16.msra.mxu0 %v3290_v40  ;;  %v3299_v40 = vld [vmem:[#allocation4 + $0x250] sm:$0xff]   ;;  %v1343_v45 = vpack.c.bf16 %v4267_v30, %v4224_v39  ;;  %v1342_v39 = vpack.c.bf16 %v4274_v1, %v4230_v15  ;;  %v3305_v30 = vld [vmem:[#allocation4 + $0x260] sm:$0xff]   ;;  %v1348_v52 = vpack.c.bf16 %v828_v5, %v4271_v46  ;;  %v1347_v15 = vpack.c.bf16 %v825_v57, %v4277_v50 }
 0x1d8   : > { %v3202_v61 = vunpack.i.h.bf16 %v3200_v56  ;;  %v3201_v4 = vunpack.i.l.bf16 %v3200_v56  ;;  %v3197_v63 = vunpack.i.h.bf16 %v3195_v58  ;;  %v3196_v20 = vunpack.i.l.bf16 %v3195_v58  ;;  %2365 = vmatprep.subr.bf16.mxu0 %v3455_v37  ;;  %v3310_v56 = vld [vmem:[#allocation4 + $0x1b0] sm:$0xff]   ;;  %v3311_v58 = vld [vmem:[#allocation4 + $0x1f8] sm:$0xff]  }
 0x1d9   : > { %v1345_v46 = vpack.c.bf16 %v4262_v24, %v4259_v16  ;;  %v879_v50 = vrot.slane %v4091_v10, 4 }
 0x1da   : > { %v898_v59 = vsel %vm781_vm3, %v897_v9, %v3197_v63  ;;  %v4325_v23 = vsel %vm781_vm3, %v900_v33, %v3196_v20  ;;  %2187 = vmatmul.mubr.bf16.vlgmr.msra.gmra.mrb[24].mxu1 %v1333_v48  ;;  %v4356_v48 = vpop.f32.mrb[6].mxu1 }
 0x1db   : > { %2819 = vmatpush3.bf16.msra.mxu1 %v3292_v62  ;;  %2194 = vmatprep.mubr.bf16.mxu1 %v4318_v36  ;;  %v4330_v35 = vsel %vm790_vm5, %v4325_v23, %v3201_v4  ;;  %v4334_v14 = vsel %vm790_vm5, %v898_v59, %v3202_v61  ;;  %v4359_v7 = vpop.f32.mrb[7].mxu1  ;;  %v3205_v53 = vpop.permute.xlu0 %3204  ;;  %v3312_v61 = vld [vmem:[#allocation4 + $0x1b8] sm:$0xff]   ;;  %v880_v33 = vsel %vm588_vm10, %v845_v31, %v879_v50 }
 0x1dc   : > { %2366 = vmatpush1.bf16.msra.mxu0 %v3293_v60  ;;  %2820 = vmatprep.subr.bf16.mxu1 %v3294_v8  ;;  %v1351_v18 = vpack.c.bf16 %v4330_v35, %v828_v5  ;;  %v4342_v28 = vpack.c.bf16 %v4334_v14, %v825_v57  ;;  %v3210_v1 = vpop.permute.xlu1 %3209  ;;  %v3206_v24 = vunpack.i.l.bf16 %v3205_v53 }
 0x1dd   : > { %2367 = vmatprep.subr.bf16.mxu0 %v3455_v37  ;;  %v3211_v9 = vunpack.i.l.bf16 %v3210_v1 }
 0x1de   : > { %2275 = vmatprep.mubr.bf16.mxu0 %v1351_v18 }
 0x1df   : > { %2821 = vmatpush3.bf16.msra.mxu1 %v3295_v0  ;;  %2276 = vmatmul.mubr.bf16.gmra.mrb[20].mxu0 %v4342_v28  ;;  %v3215_v62 = vpop.permute.xlu0 %3214 }
 0x1e0   : > { %2368 = vmatpush1.bf16.msra.mxu0 %v3296_v38  ;;  %2822 = vmatprep.subr.bf16.mxu1 %v3297_v47  ;;  %v3220_v4 = vpop.permute.xlu1 %3219  ;;  %v3216_v21 = vunpack.i.l.bf16 %v3215_v62  ;;  %v3212_v38 = vunpack.i.h.bf16 %v3210_v1  ;;  %v3217_v18 = vunpack.i.h.bf16 %v3215_v62 }
 0x1e1   : > { %2369 = vmatprep.subr.bf16.mxu0 %v3455_v37  ;;  %2675 = vmatprep.mubr.msk.bf16.mxu0 %vm790_vm5, %v1340_v44  ;;  %v3222_v63 = vunpack.i.h.bf16 %v3220_v4  ;;  %v3221_v8 = vunpack.i.l.bf16 %v3220_v4 }
 0x1e2   : > { %2195 = vmatmul.mubr.bf16.gmra.mrb[28].mxu1 %v1337_v3 }
 0x1e3   : > { %2823 = vmatpush3.bf16.msra.mxu1 %v3298_v34  ;;  %2202 = vmatprep.mubr.bf16.mxu1 %v1343_v45  ;;  %v3225_v20 = vpop.permute.xlu0 %3224 }
 0x1e4   : > { %2370 = vmatpush1.bf16.msra.mxu0 %v3299_v40  ;;  %2824 = vmatprep.subr.bf16.mxu1 %v3300_v19  ;;  %v3227_v60 = vunpack.i.h.bf16 %v3225_v20  ;;  %v923_v57 = vpop.permute.xlu1 %922 }
 0x1e5   : > { %2371 = vmatprep.subr.bf16.mxu0 %v3455_v37 }
 0x1e7   : > { %2825 = vmatpush3.bf16.msra.mxu1 %v3301_v25 }
 0x1e8   : > { %2372 = vmatpush1.bf16.msra.mxu0 %v3302_v27  ;;  %2826 = vmatprep.subr.bf16.mxu1 %v3303_v11 }
 0x1e9   : > { %2373 = vmatprep.subr.bf16.mxu0 %v3455_v37 }
 0x1ea   : > { %2203 = vmatmul.mubr.bf16.gmra.mrb[32].mxu1 %v1342_v39 }
 0x1eb   : > { %2827 = vmatpush3.bf16.msra.mxu1 %v3304_v49  ;;  %2210 = vmatprep.mubr.bf16.mxu1 %v1348_v52 }
 0x1ec   : > { %2374 = vmatpush1.bf16.msra.mxu0 %v3305_v30  ;;  %2828 = vmatprep.subr.bf16.mxu1 %v3306_v51 }
 0x1ed   : > { %2375 = vmatprep.subr.bf16.mxu0 %v3455_v37  ;;  %v925_v37 = vrot.slane %v4103_v22, 4 }
 0x1ef   : > { %2829 = vmatpush3.bf16.msra.mxu1 %v3307_v55  ;;  %v926_v16 = vsel %vm588_vm10, %v879_v50, %v925_v37 }
 0x1f0   : > { %2376 = vmatpush1.bf16.msra.mxu0 %v3308_v6  ;;  %2830 = vmatprep.subr.bf16.mxu1 %v3309_v2  ;;  %v941_v22 = vsel %vm431_vm0, %v926_v16, %v3222_v63 }
 0x1f1   : > { %v942_v59 = vsel %vm781_vm3, %v941_v22, %v3227_v60 }
 0x1f2   : > { %2211 = vmatmul.mubr.bf16.gmra.mrb[36].mxu1 %v1347_v15 }
 0x1f3   : > { %2382 = vmatmul.mubr.bf16.vlgmr.msra.gmra.mrb[24].mxu0 %v4236_v29  ;;  %2831 = vmatpush3.bf16.msra.mxu1 %v3310_v56  ;;  %v1350_v29 = vpack.c.bf16 %v4325_v23, %v4322_v42  ;;  %v3226_v42 = vunpack.i.l.bf16 %v3225_v20  ;;  %v3207_v23 = vunpack.i.h.bf16 %v3205_v53 }
 0x1f4   : > { %2676 = vmatprep.mubr.msk.bf16.mxu0 %vm790_vm5, %v1345_v46  ;;  %2316 = vmatprep.mubr.bf16.mxu1 %v4318_v36  ;;  %v906_v36 = vsel %vm431_vm0, %v880_v33, %v3206_v24 }
 0x1f5   : > { %2832 = vmatprep.subr.bf16.mxu1 %v3311_v58  ;;  %v907_v0 = vsel %vm781_vm3, %v906_v36, %v3211_v9  ;;  %v903_v31 = vsel %vm431_vm0, %v4069_v54, %v3207_v23 }
 0x1f6   : > { %v1355_v5 = vpack.c.bf16 %v942_v59, %v907_v0  ;;  %v908_v34 = vsel %vm790_vm5, %v907_v0, %v3216_v21  ;;  %v904_v44 = vsel %vm781_vm3, %v903_v31, %v3212_v38 }
 0x1f7   : > { %2833 = vmatpush3.bf16.msra.mxu1 %v3312_v61  ;;  %v1353_v19 = vpack.c.bf16 %v908_v34, %v4330_v35 }
 0x1fa   : > { %2317 = vmatmul.mubr.bf16.vlgmr.msra.gmra.mrb[40].mxu1 %v1337_v3  ;;  %v905_v3 = vsel %vm790_vm5, %v904_v44, %v3217_v18 }
 0x1fb   : > { %2390 = vmatmul.mubr.bf16.gmra.mrb[28].mxu0 %v4283_v17  ;;  %2324 = vmatprep.mubr.bf16.mxu1 %v1343_v45  ;;  %v938_v17 = vsel %vm431_vm0, %v4091_v10, %v3221_v8 }
 0x1fc   : > { %2677 = vmatprep.mubr.msk.bf16.mxu0 %vm790_vm5, %v1350_v29  ;;  %v939_v47 = vsel %vm781_vm3, %v938_v17, %v3226_v42 }
 0x1fd   : > { %v940_v10 = vsel %vm790_vm5, %v939_v47, %v923_v57 }
 0x1fe   : > { %v1354_v40 = vpack.c.bf16 %v940_v10, %v905_v3 }
 0x202   : > { %2325 = vmatmul.mubr.bf16.gmra.mrb[44].mxu1 %v1342_v39 }
 0x203   : > { %2398 = vmatmul.mubr.bf16.gmra.mrb[32].mxu0 %v4342_v28  ;;  %2332 = vmatprep.mubr.bf16.mxu1 %v1348_v52  ;;  %v1352_v28 = vpack.c.bf16 %v905_v3, %v4334_v14 }
 0x204   : > { %2678 = vmatprep.mubr.msk.bf16.mxu0 %vm790_vm5, %v1355_v5 }
 0x20a   : > { %2333 = vmatmul.mubr.bf16.gmra.mrb[48].mxu1 %v1347_v15 }
 0x20b   : > { %2406 = vmatmul.mubr.bf16.gmra.mrb[36].mxu0 %v1354_v40  ;;  %2340 = vmatprep.mubr.bf16.mxu1 %v1353_v19 }
 0x212   : > { %2341 = vmatmul.mubr.bf16.gmra.mrb[52].mxu1 %v1352_v28 }
 0x281   : > { %v2714_v54 = vpop.f32.mrb[8].mxu1 }
 0x282   : > { %v2715_v45 = vpop.f32.mrb[9].mxu1 }
 0x283   : > { %v2716_v25 = vadd.f32 %v2715_v45, %v2714_v54  ;;  %v2717_v27 = vpop.f32.mrb[10].mxu1 }
 0x284   : > { %v2718_v11 = vpop.f32.mrb[11].mxu1 }
 0x285   : > { %v2124_v49 = vadd.f32 %v2716_v25, %v4290_v26  ;;  %v2719_v39 = vadd.f32 %v2718_v11, %v2717_v27 }
 0x287   : > { %v2127_v30 = vadd.f32 %v2719_v39, %v4298_v13 }
 0x28d   : > { %v2720_v51 = vpop.f32.mrb[12].mxu1  ;;  %v2794_v52 = vpop.f32.mrb[8].mxu0 }
 0x28e   : > { %v2721_v55 = vpop.f32.mrb[13].mxu1  ;;  %v2795_v53 = vpop.f32.mrb[9].mxu0 }
 0x28f   : > { %v2722_v35 = vadd.f32 %v2721_v55, %v2720_v51  ;;  %v2723_v6 = vpop.f32.mrb[14].mxu1  ;;  %v2796_v2 = vadd.f32 %v2795_v53, %v2794_v52  ;;  %v2797_v56 = vpop.f32.mrb[10].mxu0 }
 0x290   : > { %v2724_v14 = vpop.f32.mrb[15].mxu1  ;;  %v2798_v58 = vpop.f32.mrb[11].mxu0 }
 0x291   : > { %v2132_v15 = vadd.f32 %v4285_v43, %v2722_v35  ;;  %v2725_v1 = vadd.f32 %v2724_v14, %v2723_v6  ;;  %v2799_v46 = vadd.f32 %v2798_v58, %v2797_v56 }
 0x293   : > { %v2135_v62 = vadd.f32 %v4295_v12, %v2725_v1 }
 0x299   : > { %v2726_v26 = vpop.f32.mrb[16].mxu1  ;;  %v2800_v61 = vpop.f32.mrb[12].mxu0 }
 0x29a   : > { %v2727_v37 = vpop.f32.mrb[17].mxu1  ;;  %v2801_v13 = vpop.f32.mrb[13].mxu0 }
 0x29b   : > { %v2728_v4 = vadd.f32 %v2727_v37, %v2726_v26  ;;  %v2802_v50 = vadd.f32 %v2801_v13, %v2800_v61  ;;  %v2729_v63 = vpop.f32.mrb[18].mxu1  ;;  %v2803_v20 = vpop.f32.mrb[14].mxu0 }
 0x29c   : > { %v2730_v16 = vpop.f32.mrb[19].mxu1  ;;  %v2804_v29 = vpop.f32.mrb[15].mxu0 }
 0x29d   : > { %v2140_v24 = vadd.f32 %v2728_v4, %v4350_v41  ;;  %v2731_v60 = vadd.f32 %v2730_v16, %v2729_v63  ;;  %v2805_v22 = vadd.f32 %v2804_v29, %v2803_v20 }
 0x29f   : > { %v2143_v43 = vadd.f32 %v2731_v60, %v4359_v7 }
 0x2a5   : > { %v2732_v8 = vpop.f32.mrb[20].mxu1  ;;  %v2806_v9 = vpop.f32.mrb[16].mxu0 }
 0x2a6   : > { %v2733_v33 = vpop.f32.mrb[21].mxu1  ;;  %v2807_v36 = vpop.f32.mrb[17].mxu0 }
 0x2a7   : > { %v2734_v12 = vadd.f32 %v2733_v33, %v2732_v8  ;;  %v2735_v59 = vpop.f32.mrb[22].mxu1  ;;  %v2808_v42 = vadd.f32 %v2807_v36, %v2806_v9  ;;  %v2809_v23 = vpop.f32.mrb[18].mxu0 }
 0x2a8   : > { %v2736_v17 = vpop.f32.mrb[23].mxu1  ;;  %v2810_v5 = vpop.f32.mrb[19].mxu0 }
 0x2a9   : > { %v2148_v0 = vadd.f32 %v4344_v32, %v2734_v12  ;;  %v2737_v21 = vadd.f32 %v2736_v17, %v2735_v59  ;;  %v2811_v38 = vadd.f32 %v2810_v5, %v2809_v23 }
 0x2ab   : > { %v2151_v41 = vadd.f32 %v4356_v48, %v2737_v21 }
 0x2ad   : > { %v2754_v57 = vpop.f32.mrb[24].mxu1 }
 0x2ae   : > { %v2755_v47 = vpop.f32.mrb[25].mxu1 }
 0x2af   : > { %v2756_v31 = vadd.f32 %v2755_v47, %v2754_v57  ;;  %v2757_v7 = vpop.f32.mrb[26].mxu1 }
 0x2b0   : > { %v2758_v18 = vpop.f32.mrb[27].mxu1 }
 0x2b1   : > { %v2189_v10 = vadd.f32 %v2756_v31, %v2124_v49  ;;  %v2759_v34 = vadd.f32 %v2758_v18, %v2757_v7 }
 0x2b2   : > { %v2812_v40 = vpop.f32.mrb[20].mxu0 }
 0x2b3   : > { %v2192_v44 = vadd.f32 %v2759_v34, %v2127_v30  ;;  %v2254_v3 = vadd.f32 %v2796_v2, %v2189_v10  ;;  %v2813_v19 = vpop.f32.mrb[21].mxu0 }
 0x2b4   : > { %v2814_v45 = vadd.f32 %v2813_v19, %v2812_v40  ;;  %v2815_v32 = vpop.f32.mrb[22].mxu0 }
 0x2b5   : > { %v2760_v28 = vpop.f32.mrb[28].mxu1  ;;  %v2257_v54 = vadd.f32 %v2799_v46, %v2192_v44  ;;  %v2816_v27 = vpop.f32.mrb[23].mxu0 }
 0x2b6   : > { %v2761_v25 = vpop.f32.mrb[29].mxu1  ;;  %v2817_v48 = vadd.f32 %v2816_v27, %v2815_v32 }
 0x2b7   : > { %v2762_v11 = vadd.f32 %v2761_v25, %v2760_v28  ;;  %v2763_v39 = vpop.f32.mrb[30].mxu1 }
 0x2b8   : > { %v2764_v51 = vpop.f32.mrb[31].mxu1 }
 0x2b9   : > { %v2197_v52 = vadd.f32 %v2762_v11, %v2132_v15  ;;  %v2765_v55 = vadd.f32 %v2764_v51, %v2763_v39 }
 0x2bb   : > { %v2200_v35 = vadd.f32 %v2765_v55, %v2135_v62  ;;  %v2262_v53 = vadd.f32 %v2802_v50, %v2197_v52 }
 0x2bd   : > { %v2766_v49 = vpop.f32.mrb[32].mxu1  ;;  %v2265_v6 = vadd.f32 %v2805_v22, %v2200_v35 }
 0x2be   : > { %v2767_v30 = vpop.f32.mrb[33].mxu1 }
 0x2bf   : > { %v2768_v2 = vadd.f32 %v2767_v30, %v2766_v49  ;;  %v2769_v56 = vpop.f32.mrb[34].mxu1 }
 0x2c0   : > { %v2770_v14 = vpop.f32.mrb[35].mxu1 }
 0x2c1   : > { %v2205_v1 = vadd.f32 %v2768_v2, %v2140_v24  ;;  %v2771_v58 = vadd.f32 %v2770_v14, %v2769_v56 }
 0x2c3   : > { %v2208_v46 = vadd.f32 %v2771_v58, %v2143_v43  ;;  %v4408_v26 = vadd.f32 %v2808_v42, %v2205_v1 }
 0x2c5   : > { %v2772_v61 = vpop.f32.mrb[36].mxu1  ;;  %v4410_v37 = vadd.f32 %v2811_v38, %v2208_v46 }
 0x2c6   : > { %v2383_v13 = vpop.f32.mrb[24].mxu0  ;;  %v2773_v4 = vpop.f32.mrb[37].mxu1 }
 0x2c7   : > { %v2385_v15 = vpop.f32.mrb[25].mxu0  ;;  %v2774_v63 = vadd.f32 %v2773_v4, %v2772_v61  ;;  %v2775_v62 = vpop.f32.mrb[38].mxu1 }
 0x2c8   : > { %v2386_v50 = vpop.f32.mrb[26].mxu0  ;;  %v2776_v20 = vpop.f32.mrb[39].mxu1 }
 0x2c9   : > { %v2213_v16 = vadd.f32 %v2774_v63, %v2148_v0  ;;  %v2388_v29 = vpop.f32.mrb[27].mxu0  ;;  %v2777_v60 = vadd.f32 %v2776_v20, %v2775_v62 }
 0x2cb   : > { %v2216_v22 = vadd.f32 %v2777_v60, %v2151_v41  ;;  %v4412_v24 = vadd.f32 %v2814_v45, %v2213_v16 }
 0x2cd   : > { %v2834_v43 = vpop.f32.mrb[40].mxu1  ;;  %v4414_v8 = vadd.f32 %v2817_v48, %v2216_v22 }
 0x2ce   : > { %v2391_v9 = vpop.f32.mrb[28].mxu0  ;;  %v2835_v33 = vpop.f32.mrb[41].mxu1 }
 0x2cf   : > { %v2393_v12 = vpop.f32.mrb[29].mxu0  ;;  %v2836_v36 = vadd.f32 %v2835_v33, %v2834_v43  ;;  %v2837_v59 = vpop.f32.mrb[42].mxu1 }
 0x2d0   : > { %v2394_v42 = vpop.f32.mrb[30].mxu0  ;;  %v2838_v23 = vpop.f32.mrb[43].mxu1 }
 0x2d1   : > { %v2319_v17 = vadd.f32 %v2836_v36, %v2254_v3  ;;  %v2396_v21 = vpop.f32.mrb[31].mxu0  ;;  %v2839_v0 = vadd.f32 %v2838_v23, %v2837_v59 }
 0x2d3   : > { %v2384_v5 = vadd.f32 %v2383_v13, %v2319_v17  ;;  %v2322_v38 = vadd.f32 %v2839_v0, %v2257_v54 }
 0x2d5   : > { %2414 = vst [vmem:[%s3590_s17] sm:$0xff] %v2384_v5  ;;  %v2387_v41 = vadd.f32 %v2386_v50, %v2322_v38  ;;  %v2840_v57 = vpop.f32.mrb[44].mxu1  ;;  %v2439_v7 = vmul.f32 %v2384_v5, %v2384_v5 }
 0x2d6   : > { %v2399_v47 = vpop.f32.mrb[32].mxu0  ;;  %v2841_v31 = vpop.f32.mrb[45].mxu1 }
 0x2d7   : > { %2415 = vst [vmem:[%s3590_s17 + $0x8] sm:$0xff] %v2387_v41  ;;  %v2423_v18 = vadd.f32 %v2387_v41, %v2384_v5  ;;  %v2440_v10 = vmul.f32 %v2387_v41, %v2387_v41  ;;  %v2401_v34 = vpop.f32.mrb[33].mxu0  ;;  %v2842_v44 = vadd.f32 %v2841_v31, %v2840_v57  ;;  %v2843_v40 = vpop.f32.mrb[46].mxu1 }
 0x2d8   : > { %v2402_v19 = vpop.f32.mrb[34].mxu0  ;;  %v2844_v3 = vpop.f32.mrb[47].mxu1 }
 0x2d9   : > { %v2447_v28 = vadd.f32 %v2440_v10, %v2439_v7  ;;  %v2327_v45 = vadd.f32 %v2842_v44, %v2262_v53  ;;  %v2404_v32 = vpop.f32.mrb[35].mxu0  ;;  %v2845_v54 = vadd.f32 %v2844_v3, %v2843_v40 }
 0x2db   : > { %v2392_v25 = vadd.f32 %v2391_v9, %v2327_v45  ;;  %v2330_v27 = vadd.f32 %v2845_v54, %v2265_v6 }
 0x2dd   : > { %2416 = vst [vmem:[%s3590_s17 + $0x10] sm:$0xff] %v2392_v25  ;;  %v2424_v11 = vadd.f32 %v2423_v18, %v2392_v25  ;;  %v2441_v39 = vmul.f32 %v2392_v25, %v2392_v25  ;;  %v2395_v48 = vadd.f32 %v2394_v42, %v2330_v27  ;;  %v2846_v51 = vpop.f32.mrb[48].mxu1 }
 0x2de   : > { %v2407_v52 = vpop.f32.mrb[36].mxu0  ;;  %v2847_v55 = vpop.f32.mrb[49].mxu1 }
 0x2df   : > { %v2448_v35 = vadd.f32 %v2447_v28, %v2441_v39  ;;  %2417 = vst [vmem:[%s3590_s17 + $0x18] sm:$0xff] %v2395_v48  ;;  %v2425_v49 = vadd.f32 %v2424_v11, %v2395_v48  ;;  %v2442_v30 = vmul.f32 %v2395_v48, %v2395_v48  ;;  %v2409_v2 = vpop.f32.mrb[37].mxu0  ;;  %v2848_v56 = vadd.f32 %v2847_v55, %v2846_v51  ;;  %v2849_v14 = vpop.f32.mrb[50].mxu1 }
 0x2e0   : > { %v2410_v53 = vpop.f32.mrb[38].mxu0  ;;  %v2850_v1 = vpop.f32.mrb[51].mxu1 }
 0x2e1   : > { %v2449_v58 = vadd.f32 %v2448_v35, %v2442_v30  ;;  %v2335_v6 = vadd.f32 %v2848_v56, %v4408_v26  ;;  %v2412_v46 = vpop.f32.mrb[39].mxu0  ;;  %v2851_v61 = vadd.f32 %v2850_v1, %v2849_v14 }
 0x2e3   : > { %v2400_v13 = vadd.f32 %v2399_v47, %v2335_v6  ;;  %v2338_v4 = vadd.f32 %v2851_v61, %v4410_v37 }
 0x2e5   : > { %2418 = vst [vmem:[%s3590_s17 + $0x20] sm:$0xff] %v2400_v13  ;;  %v2426_v15 = vadd.f32 %v2425_v49, %v2400_v13  ;;  %v2443_v63 = vmul.f32 %v2400_v13, %v2400_v13  ;;  %v2403_v62 = vadd.f32 %v2402_v19, %v2338_v4  ;;  %v2852_v50 = vpop.f32.mrb[52].mxu1 }
 0x2e6   : > { %v2853_v20 = vpop.f32.mrb[53].mxu1 }
 0x2e7   : > { %v2450_v16 = vadd.f32 %v2449_v58, %v2443_v63  ;;  %2419 = vst [vmem:[%s3590_s17 + $0x28] sm:$0xff] %v2403_v62  ;;  %v2427_v29 = vadd.f32 %v2426_v15, %v2403_v62  ;;  %v2444_v60 = vmul.f32 %v2403_v62, %v2403_v62  ;;  %v2854_v22 = vadd.f32 %v2853_v20, %v2852_v50  ;;  %v2855_v26 = vpop.f32.mrb[54].mxu1 }
 0x2e8   : > { %v2856_v43 = vpop.f32.mrb[55].mxu1 }
 0x2e9   : > { %v2451_v9 = vadd.f32 %v2450_v16, %v2444_v60  ;;  %v2343_v37 = vadd.f32 %v2854_v22, %v4412_v24  ;;  %v2857_v33 = vadd.f32 %v2856_v43, %v2855_v26 }
 0x2eb   : > { %v2408_v12 = vadd.f32 %v2407_v52, %v2343_v37  ;;  %v2346_v36 = vadd.f32 %v2857_v33, %v4414_v8 }
 0x2ed   : > { %2420 = vst [vmem:[%s3590_s17 + $0x30] sm:$0xff] %v2408_v12  ;;  %v2428_v59 = vadd.f32 %v2427_v29, %v2408_v12  ;;  %v2445_v42 = vmul.f32 %v2408_v12, %v2408_v12  ;;  %v2411_v23 = vadd.f32 %v2410_v53, %v2346_v36 }
 0x2ef   : > { %v2452_v24 = vadd.f32 %v2451_v9, %v2445_v42  ;;  %2421 = vst [vmem:[%s3590_s17 + $0x38] sm:$0xff] %v2411_v23  ;;  %v2429_v17 = vadd.f32 %v2428_v59, %v2411_v23  ;;  %v2446_v21 = vmul.f32 %v2411_v23, %v2411_v23 }
 0x2f0   : > { %3358 = shalt.err (!%p3355_p8)
}
 0x2f1   : > { %s3359_s13 = scalar_lea.hbm %s4431_s14, 1024  ;;  %s3363_s20 = scalar_lea.hbm %s4508_s5, 2048 }
 0x2f2   : > { %p3360_p12 = scmp.ne.s32.totalorder %s4431_s14, %s3359_s13  ;;  %p3364_p2 = scmp.lt.u32.totalorder %s4431_s14, %s4508_s5 }
 0x2f3   : > { %p3365_p5 = scmp.lt.u32.totalorder %s3363_s20, %s3359_s13  ;;  %p3367_p9 = scmp.lt.u32.totalorder %s3359_s13, %s4431_s14 }
 0x2f4   : > { %p3361_p0 = pnand %p3360_p12, %p4522_p10 }
 0x2f5   : > { %p3366_p6 = por %p3365_p5, %p3364_p2 }
 0x2f6   : > { %p3362_p3 = pneg %p3361_p0 }
 0x2f7   : > { %p3368_p11 = por %p3367_p9, %p3366_p6 }
 0x2f9   : > { %p3369_p13 = pnand %p3368_p11, %p3362_p3 }
 0x2fb   : > { %3372 = shalt.err (!%p3369_p13)
}
 0x2fc   : > { %s3457_s12 = smov 128   ;;  %v2430_v8 = vrot.slane %v2429_v17, 4  ;;  %v2453_v0 = vadd.f32 %v2452_v24, %v2446_v21  ;;  %v2422_v10 = vld [vmem:[#allocation8] sm:$0x1]  ;;  %v2438_v40 = vld [vmem:[#allocation8 + $0x1] sm:$0x1] }
 0x2fd   : > { %2887 = dma.vmem_to_hbm [thread:$0]  (%p4522_p10), %s4434_s28, 1024, %s4431_s14, %s4439_s15, %s3457_s12, %s3457_s12, %s3451_s10  }
 0x2fe   : > { %v2431_v5 = vadd.f32 %v2430_v8, %v2429_v17  ;;  %v2454_v38 = vrot.slane %v2453_v0, 4  ;;  %s3458_s7 = smov [#allocation8]   ;;  %p4523_p1 = scmp.eq.s32.totalorder %s3515_s25, 1 }
 0x2ff   : > { %s2490_s11 = sshll.u32 %s3458_s7, 4  ;;  %s2491_s11 = int_to_ptr.vmem [resolvable:$true] %s2490_s11 }
 0x300   : > { %v2432_v41 = vrot.slane %v2431_v5, 2  ;;  %v2455_v57 = vadd.f32 %v2454_v38, %v2453_v0  ;;  %s3373_s10 = scalar_lea.vmem %s2491_s11, 32  ;;  %p3380_p8 = scmp.lt.s32.totalorder %s2491_s11, %s2491_s11 }
 0x301   : > { %p3374_p10 = scmp.ne.s32.totalorder %s2491_s11, %s3373_s10  ;;  %p3381_p12 = scmp.lt.s32.totalorder %s3373_s10, %s3373_s10 }
 0x302   : > { %v2433_v47 = vadd.f32 %v2432_v41, %v2431_v5  ;;  %v2456_v31 = vrot.slane %v2455_v57, 2 }
 0x303   : > { %p3375_p4 = pnand %p3374_p10, %p4523_p1  ;;  %p3382_p0 = por %p3381_p12, %p3380_p8 }
 0x304   : > { %v2434_v7 = vrot.slane %v2433_v47, 1  ;;  %v2457_v18 = vadd.f32 %v2456_v31, %v2455_v57 }
 0x305   : > { %p3376_p7 = pneg %p3375_p4 }
 0x306   : > { %v2435_v34 = vadd.f32 %v2434_v7, %v2433_v47  ;;  %v2458_v44 = vrot.slane %v2457_v18, 1 }
 0x307   : > { %p3383_p3 = pnand %p3382_p0, %p3376_p7 }
 0x308   : > { %v2436_v19 = vadd.f32 %v2435_v34, %v2422_v10  ;;  %v2459_v3 = vadd.f32 %v2458_v44, %v2457_v18 }
 0x30a   : > { %2437 = vst [vmem:[#allocation8] sm:$0x1] %v2436_v19  ;;  %v2460_v28 = vadd.f32 %v2459_v3, %v2438_v40 }
 0x30c   : > { %2461 = vst [vmem:[#allocation8 + $0x1] sm:$0x1] %v2460_v28 }
 0x30d   : > { %3386 = shalt.err (!%p3383_p3)
}
 0x30e   : > { %s3387_s15 = scalar_lea.hbm %s4509_s6, 32  ;;  %p4524_p5 = pmov %p4523_p1 }
 0x30f   : > { %p3388_p2 = scmp.ne.s32.totalorder %s4509_s6, %s3387_s15  ;;  %p3393_p11 = scmp.lt.u32.totalorder %s3387_s15, %s4509_s6 }
 0x311   : > { %p3389_p6 = pnand %p3388_p2, %p4524_p5 }
 0x313   : > { %p3390_p9 = pneg %p3389_p6 }
 0x315   : > { %p3395_p13 = pnand %p3393_p11, %p3390_p9 }
 0x317   : > { %3398 = shalt.err (!%p3395_p13)
}
 0x318   : > { %p4525_p10 = pmov %p4523_p1 }
 0x31a   : > { %2889 = dma.vmem_to_hbm [thread:$0]  (%p4525_p10), %s2491_s11, 32, %s4509_s6, [#allocation9]  }
 0x31b   : > { %3420 = dma.done.wait (%p4523_p1), [#allocation9], 32   ;;  %p4526_p4 = pmov %p4523_p1 }
 0x31d   : > { %3422 = vsyncadd (%p4526_p4), [#allocation9], 4294967264 }
 0x31e PF: > { %p2905_p7 = scmp.ge.s32.totalorder %s3441_s24, 2  ;;  %s2506_s20 = sand.u32 1, %s3429_s21  }
 0x31f   : > { %p4527_p8 = scmp.ne.s32.totalorder %s4515_s8, 0  ;;  %s2507_s26 = scalar_lea.sflag [#allocation6], %s2506_s20 }
 0x321   : > { %p2898_p12 = pnand %p2905_p7, %p4527_p8 }
 0x323   : > { %3424 = dma.done.wait (!%p2898_p12), %s2507_s26, 1024  }
 0x324   : > { %3426 = vsyncadd (!%p2898_p12), %s2507_s26, 4294966272  ;;  %p19_p0 = scmp.ge.s32.totalorder %s3519_s27, 4   ;;  %s4528_s21 = smov %s3433_s22 }
 0x325   : > { %s4529_s22 = smov %s3437_s23  ;;  %s4530_s23 = smov %s3530_s30 }
 0x326   : > { %s4531_s24 = smov %s3519_s27  ;;  %21 = sbr.rel (!%p19_p0) target bundleno = 5 (0x5), region = 92 }
 0x32d   :  { %2512 = vsyncpa [#allocation5], 1 }
 0x32e   :  { %2514 = vsyncpa [#allocation5 + $0x1], 1 }
 0x32f   :  { %2515 = vsyncpa [#allocation6], 1 }
 0x330   :  { %2517 = vsyncpa [#allocation6 + $0x1], 1 }
 0x331   :  { %2518 = vsyncpa [#allocation9], 1 }

</bundles_post_ra>
